<compile_context>
chip_gen: v6e
topology: v6e:2x2x1
jax: 0.10.0
libtpu: 0.0.40
codegen_flags: <defaults>
</compile_context>

<pallas_src>
import jax
import jax.numpy as jnp
import numpy as np
from jax.experimental import pallas as pl
from jax.experimental.pallas import tpu as pltpu


# ----------------------------------------------------------------------------
# Graph-support preprocessing (SpatialConvOrderK.compute_support) — cheap glue.
# ----------------------------------------------------------------------------
EPSILON = 1e-6


def compute_support(adj):
    """adj: (N, N) -> stacked forward/backward row-normalized supports (2, N, N)."""
    adj_fwd = adj / (adj.sum(axis=1, keepdims=True) + EPSILON)
    adj_bwd = adj.T / (adj.T.sum(axis=1, keepdims=True) + EPSILON)
    return jnp.stack([adj_fwd, adj_bwd], axis=0)


# ----------------------------------------------------------------------------
# Fused GCGRUCell forward (single pallas_call, gridded over batch).
# ----------------------------------------------------------------------------
def gcgru_cell(x, h, supports, w_r, b_r, w_u, b_u, w_c, b_c, *, order):
    """
    x        : (B, d_in, N)        f32
    h        : (B, num_units, N)   f32
    supports : (S, N, N)           f32  (stacked diffusion matrices)
    w_*      : (num_units, (1 + S*order) * (d_in + num_units))  Conv2d-layout (out, in)
    b_*      : (num_units,)
    returns  : (B, num_units, N)   f32
    """
    B, D, N = x.shape
    U = h.shape[1]
    S = supports.shape[0]
    K = int(order)
    C = D + U
    nblk = 1 + S * K  # identity block + S*K diffusion blocks

    # ---- wrapper-side layout plumbing (cheap glue, outside the kernel) ----
    x_t = jnp.transpose(x, (0, 2, 1))          # (B, N, D)  node-major
    h_t = jnp.transpose(h, (0, 2, 1))          # (B, N, U)
    supports_bf16 = supports.astype(jnp.bfloat16)

    def split_weight(w):
        # (U, nblk*C) -> per-block (C, U), then split into x-part / h-part, bf16.
        wt = jnp.transpose(w.reshape(U, nblk, C), (1, 2, 0))   # (nblk, C, U)
        return (wt[:, :D, :].astype(jnp.bfloat16),             # (nblk, D, U)
                wt[:, D:, :].astype(jnp.bfloat16))             # (nblk, U, U)

    wxr, whr = split_weight(w_r)
    wxu, whu = split_weight(w_u)
    wxc, whc = split_weight(w_c)
    br2 = b_r.reshape(1, U).astype(jnp.float32)
    bu2 = b_u.reshape(1, U).astype(jnp.float32)
    bc2 = b_c.reshape(1, U).astype(jnp.float32)

    # ---- kernel ----
    def kernel(x_ref, h_ref, a_ref,
               wxr_ref, whr_ref, br_ref,
               wxu_ref, whu_ref, bu_ref,
               wxc_ref, whc_ref, bc_ref,
               o_ref):
        xb = x_ref[...]            # (N, D) f32
        hb = h_ref[...]            # (N, U) f32

        def diffuse(f):
            # block order matches torch concat: [f, a1 f, a1^2 f, ..., aS f, .., aS^K f]
            f0 = f.astype(jnp.bfloat16)
            blocks = [f0]
            for s in range(S):
                a = a_ref[s]                                   # (N, N) bf16
                fk = f0
                for _ in range(K):
                    fk = jnp.dot(a, fk,
                                 preferred_element_type=jnp.float32
                                 ).astype(jnp.bfloat16)        # (N, Cf)
                    blocks.append(fk)
            return blocks

        def project(fx_blocks, fh_blocks, wx_ref, wh_ref, b_ref):
            # 1x1 conv = sum over diffusion blocks of (N,D)@(D,U) + (N,U)@(U,U), + bias
            acc = jnp.zeros((N, U), jnp.float32)
            for i in range(nblk):
                acc = acc + jnp.dot(fx_blocks[i], wx_ref[i],
                                    preferred_element_type=jnp.float32)
                acc = acc + jnp.dot(fh_blocks[i], wh_ref[i],
                                    preferred_element_type=jnp.float32)
            return acc + b_ref[...]                            # (N,U) + (1,U)

        dx = diffuse(xb)                   # shared by all three gates
        dh = diffuse(hb)                   # shared by forget / update gates
        r = jax.nn.sigmoid(project(dx, dh, wxr_ref, whr_ref, br_ref))
        u = jax.nn.sigmoid(project(dx, dh, wxu_ref, whu_ref, bu_ref))
        drh = diffuse(r * hb)              # candidate gate uses cat([x, r*h])
        c = jnp.tanh(project(dx, drh, wxc_ref, whc_ref, bc_ref))
        o_ref[...] = u * hb + (1.0 - u) * c

    out = pl.pallas_call(
        kernel,
        out_shape=jax.ShapeDtypeStruct((B, N, U), jnp.float32),
        grid=(B,),
        in_specs=[
            pl.BlockSpec((None, N, D), lambda b: (b, 0, 0)),     # x  (per-batch)
            pl.BlockSpec((None, N, U), lambda b: (b, 0, 0)),     # h  (per-batch)
            pl.BlockSpec((S, N, N), lambda b: (0, 0, 0)),        # supports (bf16)
            pl.BlockSpec((nblk, D, U), lambda b: (0, 0, 0)),     # forget-gate W (x-part)
            pl.BlockSpec((nblk, U, U), lambda b: (0, 0, 0)),     # forget-gate W (h-part)
            pl.BlockSpec((1, U), lambda b: (0, 0)),              # forget-gate bias
            pl.BlockSpec((nblk, D, U), lambda b: (0, 0, 0)),     # update-gate W (x-part)
            pl.BlockSpec((nblk, U, U), lambda b: (0, 0, 0)),     # update-gate W (h-part)
            pl.BlockSpec((1, U), lambda b: (0, 0)),              # update-gate bias
            pl.BlockSpec((nblk, D, U), lambda b: (0, 0, 0)),     # c-gate W (x-part)
            pl.BlockSpec((nblk, U, U), lambda b: (0, 0, 0)),     # c-gate W (h-part)
            pl.BlockSpec((1, U), lambda b: (0, 0)),              # c-gate bias
        ],
        out_specs=pl.BlockSpec((None, N, U), lambda b: (b, 0, 0)),
        compiler_params=pltpu.CompilerParams(
            dimension_semantics=("parallel",)),                  # shard batch across TCs (v7x)
    )(x_t, h_t, supports_bf16, wxr, whr, br2, wxu, whu, bu2, wxc, whc, bc2)

    return jnp.transpose(out, (0, 2, 1))     # back to PyTorch layout (B, U, N)


# ----------------------------------------------------------------------------
# Pure-JAX reference mirroring the PyTorch module exactly (f32 throughout).
# ----------------------------------------------------------------------------
def _spatial_conv_ref(feat, supports, w, b, order):
    # feat: (B, C, N); supports: (S, N, N); w: (U, C_total); b: (U,)
    out = [feat]
    for s in range(supports.shape[0]):
        a = supports[s]
        x1 = jnp.einsum('bcv,wv->bcw', feat, a)
        out.append(x1)
        for _ in range(2, order + 1):
            x1 = jnp.einsum('bcv,wv->bcw', x1, a)
            out.append(x1)
    cat = jnp.concatenate(out, axis=1)                     # (B, C_total, N)
    return jnp.einsum('oc,bcn->bon', w, cat) + b[None, :, None]


def _gcgru_ref(x, h, supports, w_r, b_r, w_u, b_u, w_c, b_c, order):
    xg = jnp.concatenate([x, h], axis=1)
    r = jax.nn.sigmoid(_spatial_conv_ref(xg, supports, w_r, b_r, order))
    u = jax.nn.sigmoid(_spatial_conv_ref(xg, supports, w_u, b_u, order))
    xc = jnp.concatenate([x, r * h], axis=1)
    c = jnp.tanh(_spatial_conv_ref(xc, supports, w_c, b_c, order))
    return u * h + (1.0 - u) * c


# ----------------------------------------------------------------------------
# Synthetic deterministic init (Conv2d (out, in) layout, like the torch module).
# ----------------------------------------------------------------------------
def init_gate_params(key, c_in_total, c_out):
    kw, kb = jax.random.split(key)
    s = 1.0 / np.sqrt(c_in_total)
    w = jax.random.uniform(kw, (c_out, c_in_total), jnp.float32, -s, s)
    b = jax.random.uniform(kb, (c_out,), jnp.float32, -s, s)
    return w, b


if __name__ == "__main__":
    # small shapes consistent with GCGRUCell.forward
    B, d_in, num_units, N = 2, 4, 32, 16
    support_len, order = 2, 2
    C_total = (1 + support_len * order) * (d_in + num_units)

    key = jax.random.PRNGKey(0)
    k_adj, kx, kh, kr, ku, kc = jax.random.split(key, 6)

    adj = jax.random.uniform(k_adj, (N, N), jnp.float32)
    supports = compute_support(adj)                     # (2, N, N)

    x = jax.random.normal(kx, (B, d_in, N), jnp.float32)
    h = jax.random.normal(kh, (B, num_units, N), jnp.float32)

    w_r, b_r = init_gate_params(kr, C_total, num_units)
    w_u, b_u = init_gate_params(ku, C_total, num_units)
    w_c, b_c = init_gate_params(kc, C_total, num_units)

    out = gcgru_cell(x, h, supports, w_r, b_r, w_u, b_u, w_c, b_c, order=order)
    out = jax.block_until_ready(out)

    ref = _gcgru_ref(x, h, supports, w_r, b_r, w_u, b_u, w_c, b_c, order)
    # bf16 matmul operands (f32 accumulate) vs f32 reference -> loose-ish tolerance
    np.testing.assert_allclose(np.asarray(out), np.asarray(ref), rtol=3e-2, atol=3e-2)

    assert out.shape == (B, num_units, N)
    assert out.dtype == jnp.float32
    print("KERNEL_OK")
</pallas_src>

<mosaic_0001>
module attributes {stable_mosaic.version = 11 : i64} {
  func.func @kernel(%arg0: i32, %arg1: memref<1x16x4xf32, #tpu.memory_space<vmem>>, %arg2: memref<1x16x32xf32, #tpu.memory_space<vmem>>, %arg3: memref<2x16x16xbf16, #tpu.memory_space<vmem>>, %arg4: memref<5x4x32xbf16, #tpu.memory_space<vmem>>, %arg5: memref<5x32x32xbf16, #tpu.memory_space<vmem>>, %arg6: memref<1x32xf32, #tpu.memory_space<vmem>>, %arg7: memref<5x4x32xbf16, #tpu.memory_space<vmem>>, %arg8: memref<5x32x32xbf16, #tpu.memory_space<vmem>>, %arg9: memref<1x32xf32, #tpu.memory_space<vmem>>, %arg10: memref<5x4x32xbf16, #tpu.memory_space<vmem>>, %arg11: memref<5x32x32xbf16, #tpu.memory_space<vmem>>, %arg12: memref<1x32xf32, #tpu.memory_space<vmem>>, %arg13: memref<1x16x32xf32, #tpu.memory_space<vmem>>) attributes {dimension_semantics = [#tpu.dimension_semantics<parallel>], iteration_bounds = array<i64: 2>, scalar_prefetch = 0 : i64, scratch_operands = 0 : i64, tpu.core_type = #tpu.core_type<tc>, window_params = [{transform_indices = @transform_0, window_bounds = array<i64: 1, 16, 4>}, {transform_indices = @transform_1, window_bounds = array<i64: 1, 16, 32>}, {pipeline_mode = #tpu.pipeline_mode<synchronous>, transform_indices = @transform_2, window_bounds = array<i64: 2, 16, 16>}, {pipeline_mode = #tpu.pipeline_mode<synchronous>, transform_indices = @transform_3, window_bounds = array<i64: 5, 4, 32>}, {pipeline_mode = #tpu.pipeline_mode<synchronous>, transform_indices = @transform_4, window_bounds = array<i64: 5, 32, 32>}, {pipeline_mode = #tpu.pipeline_mode<synchronous>, transform_indices = @transform_5, window_bounds = array<i64: 1, 32>}, {pipeline_mode = #tpu.pipeline_mode<synchronous>, transform_indices = @transform_6, window_bounds = array<i64: 5, 4, 32>}, {pipeline_mode = #tpu.pipeline_mode<synchronous>, transform_indices = @transform_7, window_bounds = array<i64: 5, 32, 32>}, {pipeline_mode = #tpu.pipeline_mode<synchronous>, transform_indices = @transform_8, window_bounds = array<i64: 1, 32>}, {pipeline_mode = #tpu.pipeline_mode<synchronous>, transform_indices = @transform_9, window_bounds = array<i64: 5, 4, 32>}, {pipeline_mode = #tpu.pipeline_mode<synchronous>, transform_indices = @transform_10, window_bounds = array<i64: 5, 32, 32>}, {pipeline_mode = #tpu.pipeline_mode<synchronous>, transform_indices = @transform_11, window_bounds = array<i64: 1, 32>}, {transform_indices = @transform_12, window_bounds = array<i64: 1, 16, 32>}]} {
    %c0 = arith.constant 0 : index
    %c0_0 = arith.constant 0 : index
    %c0_1 = arith.constant 0 : index
    %0 = vector.load %arg1[%c0, %c0_0, %c0_1] : memref<1x16x4xf32, #tpu.memory_space<vmem>>, vector<1x16x4xf32>
    %1 = vector.shape_cast %0 : vector<1x16x4xf32> to vector<16x4xf32>
    %c0_2 = arith.constant 0 : index
    %c0_3 = arith.constant 0 : index
    %c0_4 = arith.constant 0 : index
    %2 = vector.load %arg2[%c0_2, %c0_3, %c0_4] : memref<1x16x32xf32, #tpu.memory_space<vmem>>, vector<1x16x32xf32>
    %3 = vector.shape_cast %2 : vector<1x16x32xf32> to vector<16x32xf32>
    %4 = arith.truncf %1 : vector<16x4xf32> to vector<16x4xbf16>
    %c0_5 = arith.constant 0 : index
    %c0_6 = arith.constant 0 : index
    %c0_7 = arith.constant 0 : index
    %5 = vector.load %arg3[%c0_5, %c0_6, %c0_7] : memref<2x16x16xbf16, #tpu.memory_space<vmem>>, vector<1x16x16xbf16>
    %6 = vector.shape_cast %5 : vector<1x16x16xbf16> to vector<16x16xbf16>
    %cst = arith.constant dense<0.000000e+00> : vector<16x4xf32>
    %7 = tpu.matmul %6, %4, %cst {dimension_numbers = #tpu.dot_dimension_numbers<[1], [0], [0], [1], [0, 0, 1, 1], [], []>} : vector<16x16xbf16>, vector<16x4xbf16>, vector<16x4xf32> -> vector<16x4xf32>
    %8 = arith.truncf %7 : vector<16x4xf32> to vector<16x4xbf16>
    %cst_8 = arith.constant dense<0.000000e+00> : vector<16x4xf32>
    %9 = tpu.matmul %6, %8, %cst_8 {dimension_numbers = #tpu.dot_dimension_numbers<[1], [0], [0], [1], [0, 0, 1, 1], [], []>} : vector<16x16xbf16>, vector<16x4xbf16>, vector<16x4xf32> -> vector<16x4xf32>
    %10 = arith.truncf %9 : vector<16x4xf32> to vector<16x4xbf16>
    %c1 = arith.constant 1 : index
    %c0_9 = arith.constant 0 : index
    %c0_10 = arith.constant 0 : index
    %11 = vector.load %arg3[%c1, %c0_9, %c0_10] : memref<2x16x16xbf16, #tpu.memory_space<vmem>>, vector<1x16x16xbf16>
    %12 = vector.shape_cast %11 : vector<1x16x16xbf16> to vector<16x16xbf16>
    %cst_11 = arith.constant dense<0.000000e+00> : vector<16x4xf32>
    %13 = tpu.matmul %12, %4, %cst_11 {dimension_numbers = #tpu.dot_dimension_numbers<[1], [0], [0], [1], [0, 0, 1, 1], [], []>} : vector<16x16xbf16>, vector<16x4xbf16>, vector<16x4xf32> -> vector<16x4xf32>
    %14 = arith.truncf %13 : vector<16x4xf32> to vector<16x4xbf16>
    %cst_12 = arith.constant dense<0.000000e+00> : vector<16x4xf32>
    %15 = tpu.matmul %12, %14, %cst_12 {dimension_numbers = #tpu.dot_dimension_numbers<[1], [0], [0], [1], [0, 0, 1, 1], [], []>} : vector<16x16xbf16>, vector<16x4xbf16>, vector<16x4xf32> -> vector<16x4xf32>
    %16 = arith.truncf %15 : vector<16x4xf32> to vector<16x4xbf16>
    %17 = arith.truncf %3 : vector<16x32xf32> to vector<16x32xbf16>
    %c0_13 = arith.constant 0 : index
    %c0_14 = arith.constant 0 : index
    %c0_15 = arith.constant 0 : index
    %18 = vector.load %arg3[%c0_13, %c0_14, %c0_15] : memref<2x16x16xbf16, #tpu.memory_space<vmem>>, vector<1x16x16xbf16>
    %19 = vector.shape_cast %18 : vector<1x16x16xbf16> to vector<16x16xbf16>
    %cst_16 = arith.constant dense<0.000000e+00> : vector<16x32xf32>
    %20 = tpu.matmul %19, %17, %cst_16 {dimension_numbers = #tpu.dot_dimension_numbers<[1], [0], [0], [1], [0, 0, 1, 1], [], []>} : vector<16x16xbf16>, vector<16x32xbf16>, vector<16x32xf32> -> vector<16x32xf32>
    %21 = arith.truncf %20 : vector<16x32xf32> to vector<16x32xbf16>
    %cst_17 = arith.constant dense<0.000000e+00> : vector<16x32xf32>
    %22 = tpu.matmul %19, %21, %cst_17 {dimension_numbers = #tpu.dot_dimension_numbers<[1], [0], [0], [1], [0, 0, 1, 1], [], []>} : vector<16x16xbf16>, vector<16x32xbf16>, vector<16x32xf32> -> vector<16x32xf32>
    %23 = arith.truncf %22 : vector<16x32xf32> to vector<16x32xbf16>
    %c1_18 = arith.constant 1 : index
    %c0_19 = arith.constant 0 : index
    %c0_20 = arith.constant 0 : index
    %24 = vector.load %arg3[%c1_18, %c0_19, %c0_20] : memref<2x16x16xbf16, #tpu.memory_space<vmem>>, vector<1x16x16xbf16>
    %25 = vector.shape_cast %24 : vector<1x16x16xbf16> to vector<16x16xbf16>
    %cst_21 = arith.constant dense<0.000000e+00> : vector<16x32xf32>
    %26 = tpu.matmul %25, %17, %cst_21 {dimension_numbers = #tpu.dot_dimension_numbers<[1], [0], [0], [1], [0, 0, 1, 1], [], []>} : vector<16x16xbf16>, vector<16x32xbf16>, vector<16x32xf32> -> vector<16x32xf32>
    %27 = arith.truncf %26 : vector<16x32xf32> to vector<16x32xbf16>
    %cst_22 = arith.constant dense<0.000000e+00> : vector<16x32xf32>
    %28 = tpu.matmul %25, %27, %cst_22 {dimension_numbers = #tpu.dot_dimension_numbers<[1], [0], [0], [1], [0, 0, 1, 1], [], []>} : vector<16x16xbf16>, vector<16x32xbf16>, vector<16x32xf32> -> vector<16x32xf32>
    %29 = arith.truncf %28 : vector<16x32xf32> to vector<16x32xbf16>
    %cst_23 = arith.constant 0.000000e+00 : f32
    %30 = vector.broadcast %cst_23 : f32 to vector<16x32xf32>
    %c0_24 = arith.constant 0 : index
    %c0_25 = arith.constant 0 : index
    %c0_26 = arith.constant 0 : index
    %31 = vector.load %arg4[%c0_24, %c0_25, %c0_26] : memref<5x4x32xbf16, #tpu.memory_space<vmem>>, vector<1x4x32xbf16>
    %32 = vector.shape_cast %31 : vector<1x4x32xbf16> to vector<4x32xbf16>
    %cst_27 = arith.constant dense<0.000000e+00> : vector<16x32xf32>
    %33 = tpu.matmul %4, %32, %cst_27 {dimension_numbers = #tpu.dot_dimension_numbers<[1], [0], [0], [1], [0, 0, 1, 1], [], []>} : vector<16x4xbf16>, vector<4x32xbf16>, vector<16x32xf32> -> vector<16x32xf32>
    %34 = arith.addf %30, %33 : vector<16x32xf32>
    %c0_28 = arith.constant 0 : index
    %c0_29 = arith.constant 0 : index
    %c0_30 = arith.constant 0 : index
    %35 = vector.load %arg5[%c0_28, %c0_29, %c0_30] : memref<5x32x32xbf16, #tpu.memory_space<vmem>>, vector<1x32x32xbf16>
    %36 = vector.shape_cast %35 : vector<1x32x32xbf16> to vector<32x32xbf16>
    %cst_31 = arith.constant dense<0.000000e+00> : vector<16x32xf32>
    %37 = tpu.matmul %17, %36, %cst_31 {dimension_numbers = #tpu.dot_dimension_numbers<[1], [0], [0], [1], [0, 0, 1, 1], [], []>} : vector<16x32xbf16>, vector<32x32xbf16>, vector<16x32xf32> -> vector<16x32xf32>
    %38 = arith.addf %34, %37 : vector<16x32xf32>
    %c1_32 = arith.constant 1 : index
    %c0_33 = arith.constant 0 : index
    %c0_34 = arith.constant 0 : index
    %39 = vector.load %arg4[%c1_32, %c0_33, %c0_34] : memref<5x4x32xbf16, #tpu.memory_space<vmem>>, vector<1x4x32xbf16>
    %40 = vector.shape_cast %39 : vector<1x4x32xbf16> to vector<4x32xbf16>
    %cst_35 = arith.constant dense<0.000000e+00> : vector<16x32xf32>
    %41 = tpu.matmul %8, %40, %cst_35 {dimension_numbers = #tpu.dot_dimension_numbers<[1], [0], [0], [1], [0, 0, 1, 1], [], []>} : vector<16x4xbf16>, vector<4x32xbf16>, vector<16x32xf32> -> vector<16x32xf32>
    %42 = arith.addf %38, %41 : vector<16x32xf32>
    %c1_36 = arith.constant 1 : index
    %c0_37 = arith.constant 0 : index
    %c0_38 = arith.constant 0 : index
    %43 = vector.load %arg5[%c1_36, %c0_37, %c0_38] : memref<5x32x32xbf16, #tpu.memory_space<vmem>>, vector<1x32x32xbf16>
    %44 = vector.shape_cast %43 : vector<1x32x32xbf16> to vector<32x32xbf16>
    %cst_39 = arith.constant dense<0.000000e+00> : vector<16x32xf32>
    %45 = tpu.matmul %21, %44, %cst_39 {dimension_numbers = #tpu.dot_dimension_numbers<[1], [0], [0], [1], [0, 0, 1, 1], [], []>} : vector<16x32xbf16>, vector<32x32xbf16>, vector<16x32xf32> -> vector<16x32xf32>
    %46 = arith.addf %42, %45 : vector<16x32xf32>
    %c2 = arith.constant 2 : index
    %c0_40 = arith.constant 0 : index
    %c0_41 = arith.constant 0 : index
    %47 = vector.load %arg4[%c2, %c0_40, %c0_41] : memref<5x4x32xbf16, #tpu.memory_space<vmem>>, vector<1x4x32xbf16>
    %48 = vector.shape_cast %47 : vector<1x4x32xbf16> to vector<4x32xbf16>
    %cst_42 = arith.constant dense<0.000000e+00> : vector<16x32xf32>
    %49 = tpu.matmul %10, %48, %cst_42 {dimension_numbers = #tpu.dot_dimension_numbers<[1], [0], [0], [1], [0, 0, 1, 1], [], []>} : vector<16x4xbf16>, vector<4x32xbf16>, vector<16x32xf32> -> vector<16x32xf32>
    %50 = arith.addf %46, %49 : vector<16x32xf32>
    %c2_43 = arith.constant 2 : index
    %c0_44 = arith.constant 0 : index
    %c0_45 = arith.constant 0 : index
    %51 = vector.load %arg5[%c2_43, %c0_44, %c0_45] : memref<5x32x32xbf16, #tpu.memory_space<vmem>>, vector<1x32x32xbf16>
    %52 = vector.shape_cast %51 : vector<1x32x32xbf16> to vector<32x32xbf16>
    %cst_46 = arith.constant dense<0.000000e+00> : vector<16x32xf32>
    %53 = tpu.matmul %23, %52, %cst_46 {dimension_numbers = #tpu.dot_dimension_numbers<[1], [0], [0], [1], [0, 0, 1, 1], [], []>} : vector<16x32xbf16>, vector<32x32xbf16>, vector<16x32xf32> -> vector<16x32xf32>
    %54 = arith.addf %50, %53 : vector<16x32xf32>
    %c3 = arith.constant 3 : index
    %c0_47 = arith.constant 0 : index
    %c0_48 = arith.constant 0 : index
    %55 = vector.load %arg4[%c3, %c0_47, %c0_48] : memref<5x4x32xbf16, #tpu.memory_space<vmem>>, vector<1x4x32xbf16>
    %56 = vector.shape_cast %55 : vector<1x4x32xbf16> to vector<4x32xbf16>
    %cst_49 = arith.constant dense<0.000000e+00> : vector<16x32xf32>
    %57 = tpu.matmul %14, %56, %cst_49 {dimension_numbers = #tpu.dot_dimension_numbers<[1], [0], [0], [1], [0, 0, 1, 1], [], []>} : vector<16x4xbf16>, vector<4x32xbf16>, vector<16x32xf32> -> vector<16x32xf32>
    %58 = arith.addf %54, %57 : vector<16x32xf32>
    %c3_50 = arith.constant 3 : index
    %c0_51 = arith.constant 0 : index
    %c0_52 = arith.constant 0 : index
    %59 = vector.load %arg5[%c3_50, %c0_51, %c0_52] : memref<5x32x32xbf16, #tpu.memory_space<vmem>>, vector<1x32x32xbf16>
    %60 = vector.shape_cast %59 : vector<1x32x32xbf16> to vector<32x32xbf16>
    %cst_53 = arith.constant dense<0.000000e+00> : vector<16x32xf32>
    %61 = tpu.matmul %27, %60, %cst_53 {dimension_numbers = #tpu.dot_dimension_numbers<[1], [0], [0], [1], [0, 0, 1, 1], [], []>} : vector<16x32xbf16>, vector<32x32xbf16>, vector<16x32xf32> -> vector<16x32xf32>
    %62 = arith.addf %58, %61 : vector<16x32xf32>
    %c4 = arith.constant 4 : index
    %c0_54 = arith.constant 0 : index
    %c0_55 = arith.constant 0 : index
    %63 = vector.load %arg4[%c4, %c0_54, %c0_55] : memref<5x4x32xbf16, #tpu.memory_space<vmem>>, vector<1x4x32xbf16>
    %64 = vector.shape_cast %63 : vector<1x4x32xbf16> to vector<4x32xbf16>
    %cst_56 = arith.constant dense<0.000000e+00> : vector<16x32xf32>
    %65 = tpu.matmul %16, %64, %cst_56 {dimension_numbers = #tpu.dot_dimension_numbers<[1], [0], [0], [1], [0, 0, 1, 1], [], []>} : vector<16x4xbf16>, vector<4x32xbf16>, vector<16x32xf32> -> vector<16x32xf32>
    %66 = arith.addf %62, %65 : vector<16x32xf32>
    %c4_57 = arith.constant 4 : index
    %c0_58 = arith.constant 0 : index
    %c0_59 = arith.constant 0 : index
    %67 = vector.load %arg5[%c4_57, %c0_58, %c0_59] : memref<5x32x32xbf16, #tpu.memory_space<vmem>>, vector<1x32x32xbf16>
    %68 = vector.shape_cast %67 : vector<1x32x32xbf16> to vector<32x32xbf16>
    %cst_60 = arith.constant dense<0.000000e+00> : vector<16x32xf32>
    %69 = tpu.matmul %29, %68, %cst_60 {dimension_numbers = #tpu.dot_dimension_numbers<[1], [0], [0], [1], [0, 0, 1, 1], [], []>} : vector<16x32xbf16>, vector<32x32xbf16>, vector<16x32xf32> -> vector<16x32xf32>
    %70 = arith.addf %66, %69 : vector<16x32xf32>
    %c0_61 = arith.constant 0 : index
    %c0_62 = arith.constant 0 : index
    %71 = vector.load %arg6[%c0_61, %c0_62] : memref<1x32xf32, #tpu.memory_space<vmem>>, vector<1x32xf32>
    %72 = vector.broadcast %71 : vector<1x32xf32> to vector<16x32xf32>
    %73 = arith.addf %70, %72 : vector<16x32xf32>
    %74 = arith.negf %73 : vector<16x32xf32>
    %75 = math.exp %74 : vector<16x32xf32>
    %cst_63 = arith.constant 1.000000e+00 : f32
    %76 = vector.broadcast %cst_63 : f32 to vector<16x32xf32>
    %77 = arith.addf %76, %75 : vector<16x32xf32>
    %78 = arith.divf %76, %77 : vector<16x32xf32>
    %cst_64 = arith.constant 0.000000e+00 : f32
    %79 = vector.broadcast %cst_64 : f32 to vector<16x32xf32>
    %c0_65 = arith.constant 0 : index
    %c0_66 = arith.constant 0 : index
    %c0_67 = arith.constant 0 : index
    %80 = vector.load %arg7[%c0_65, %c0_66, %c0_67] : memref<5x4x32xbf16, #tpu.memory_space<vmem>>, vector<1x4x32xbf16>
    %81 = vector.shape_cast %80 : vector<1x4x32xbf16> to vector<4x32xbf16>
    %cst_68 = arith.constant dense<0.000000e+00> : vector<16x32xf32>
    %82 = tpu.matmul %4, %81, %cst_68 {dimension_numbers = #tpu.dot_dimension_numbers<[1], [0], [0], [1], [0, 0, 1, 1], [], []>} : vector<16x4xbf16>, vector<4x32xbf16>, vector<16x32xf32> -> vector<16x32xf32>
    %83 = arith.addf %79, %82 : vector<16x32xf32>
    %c0_69 = arith.constant 0 : index
    %c0_70 = arith.constant 0 : index
    %c0_71 = arith.constant 0 : index
    %84 = vector.load %arg8[%c0_69, %c0_70, %c0_71] : memref<5x32x32xbf16, #tpu.memory_space<vmem>>, vector<1x32x32xbf16>
    %85 = vector.shape_cast %84 : vector<1x32x32xbf16> to vector<32x32xbf16>
    %cst_72 = arith.constant dense<0.000000e+00> : vector<16x32xf32>
    %86 = tpu.matmul %17, %85, %cst_72 {dimension_numbers = #tpu.dot_dimension_numbers<[1], [0], [0], [1], [0, 0, 1, 1], [], []>} : vector<16x32xbf16>, vector<32x32xbf16>, vector<16x32xf32> -> vector<16x32xf32>
    %87 = arith.addf %83, %86 : vector<16x32xf32>
    %c1_73 = arith.constant 1 : index
    %c0_74 = arith.constant 0 : index
    %c0_75 = arith.constant 0 : index
    %88 = vector.load %arg7[%c1_73, %c0_74, %c0_75] : memref<5x4x32xbf16, #tpu.memory_space<vmem>>, vector<1x4x32xbf16>
    %89 = vector.shape_cast %88 : vector<1x4x32xbf16> to vector<4x32xbf16>
    %cst_76 = arith.constant dense<0.000000e+00> : vector<16x32xf32>
    %90 = tpu.matmul %8, %89, %cst_76 {dimension_numbers = #tpu.dot_dimension_numbers<[1], [0], [0], [1], [0, 0, 1, 1], [], []>} : vector<16x4xbf16>, vector<4x32xbf16>, vector<16x32xf32> -> vector<16x32xf32>
    %91 = arith.addf %87, %90 : vector<16x32xf32>
    %c1_77 = arith.constant 1 : index
    %c0_78 = arith.constant 0 : index
    %c0_79 = arith.constant 0 : index
    %92 = vector.load %arg8[%c1_77, %c0_78, %c0_79] : memref<5x32x32xbf16, #tpu.memory_space<vmem>>, vector<1x32x32xbf16>
    %93 = vector.shape_cast %92 : vector<1x32x32xbf16> to vector<32x32xbf16>
    %cst_80 = arith.constant dense<0.000000e+00> : vector<16x32xf32>
    %94 = tpu.matmul %21, %93, %cst_80 {dimension_numbers = #tpu.dot_dimension_numbers<[1], [0], [0], [1], [0, 0, 1, 1], [], []>} : vector<16x32xbf16>, vector<32x32xbf16>, vector<16x32xf32> -> vector<16x32xf32>
    %95 = arith.addf %91, %94 : vector<16x32xf32>
    %c2_81 = arith.constant 2 : index
    %c0_82 = arith.constant 0 : index
    %c0_83 = arith.constant 0 : index
    %96 = vector.load %arg7[%c2_81, %c0_82, %c0_83] : memref<5x4x32xbf16, #tpu.memory_space<vmem>>, vector<1x4x32xbf16>
    %97 = vector.shape_cast %96 : vector<1x4x32xbf16> to vector<4x32xbf16>
    %cst_84 = arith.constant dense<0.000000e+00> : vector<16x32xf32>
    %98 = tpu.matmul %10, %97, %cst_84 {dimension_numbers = #tpu.dot_dimension_numbers<[1], [0], [0], [1], [0, 0, 1, 1], [], []>} : vector<16x4xbf16>, vector<4x32xbf16>, vector<16x32xf32> -> vector<16x32xf32>
    %99 = arith.addf %95, %98 : vector<16x32xf32>
    %c2_85 = arith.constant 2 : index
    %c0_86 = arith.constant 0 : index
    %c0_87 = arith.constant 0 : index
    %100 = vector.load %arg8[%c2_85, %c0_86, %c0_87] : memref<5x32x32xbf16, #tpu.memory_space<vmem>>, vector<1x32x32xbf16>
    %101 = vector.shape_cast %100 : vector<1x32x32xbf16> to vector<32x32xbf16>
    %cst_88 = arith.constant dense<0.000000e+00> : vector<16x32xf32>
    %102 = tpu.matmul %23, %101, %cst_88 {dimension_numbers = #tpu.dot_dimension_numbers<[1], [0], [0], [1], [0, 0, 1, 1], [], []>} : vector<16x32xbf16>, vector<32x32xbf16>, vector<16x32xf32> -> vector<16x32xf32>
    %103 = arith.addf %99, %102 : vector<16x32xf32>
    %c3_89 = arith.constant 3 : index
    %c0_90 = arith.constant 0 : index
    %c0_91 = arith.constant 0 : index
    %104 = vector.load %arg7[%c3_89, %c0_90, %c0_91] : memref<5x4x32xbf16, #tpu.memory_space<vmem>>, vector<1x4x32xbf16>
    %105 = vector.shape_cast %104 : vector<1x4x32xbf16> to vector<4x32xbf16>
    %cst_92 = arith.constant dense<0.000000e+00> : vector<16x32xf32>
    %106 = tpu.matmul %14, %105, %cst_92 {dimension_numbers = #tpu.dot_dimension_numbers<[1], [0], [0], [1], [0, 0, 1, 1], [], []>} : vector<16x4xbf16>, vector<4x32xbf16>, vector<16x32xf32> -> vector<16x32xf32>
    %107 = arith.addf %103, %106 : vector<16x32xf32>
    %c3_93 = arith.constant 3 : index
    %c0_94 = arith.constant 0 : index
    %c0_95 = arith.constant 0 : index
    %108 = vector.load %arg8[%c3_93, %c0_94, %c0_95] : memref<5x32x32xbf16, #tpu.memory_space<vmem>>, vector<1x32x32xbf16>
    %109 = vector.shape_cast %108 : vector<1x32x32xbf16> to vector<32x32xbf16>
    %cst_96 = arith.constant dense<0.000000e+00> : vector<16x32xf32>
    %110 = tpu.matmul %27, %109, %cst_96 {dimension_numbers = #tpu.dot_dimension_numbers<[1], [0], [0], [1], [0, 0, 1, 1], [], []>} : vector<16x32xbf16>, vector<32x32xbf16>, vector<16x32xf32> -> vector<16x32xf32>
    %111 = arith.addf %107, %110 : vector<16x32xf32>
    %c4_97 = arith.constant 4 : index
    %c0_98 = arith.constant 0 : index
    %c0_99 = arith.constant 0 : index
    %112 = vector.load %arg7[%c4_97, %c0_98, %c0_99] : memref<5x4x32xbf16, #tpu.memory_space<vmem>>, vector<1x4x32xbf16>
    %113 = vector.shape_cast %112 : vector<1x4x32xbf16> to vector<4x32xbf16>
    %cst_100 = arith.constant dense<0.000000e+00> : vector<16x32xf32>
    %114 = tpu.matmul %16, %113, %cst_100 {dimension_numbers = #tpu.dot_dimension_numbers<[1], [0], [0], [1], [0, 0, 1, 1], [], []>} : vector<16x4xbf16>, vector<4x32xbf16>, vector<16x32xf32> -> vector<16x32xf32>
    %115 = arith.addf %111, %114 : vector<16x32xf32>
    %c4_101 = arith.constant 4 : index
    %c0_102 = arith.constant 0 : index
    %c0_103 = arith.constant 0 : index
    %116 = vector.load %arg8[%c4_101, %c0_102, %c0_103] : memref<5x32x32xbf16, #tpu.memory_space<vmem>>, vector<1x32x32xbf16>
    %117 = vector.shape_cast %116 : vector<1x32x32xbf16> to vector<32x32xbf16>
    %cst_104 = arith.constant dense<0.000000e+00> : vector<16x32xf32>
    %118 = tpu.matmul %29, %117, %cst_104 {dimension_numbers = #tpu.dot_dimension_numbers<[1], [0], [0], [1], [0, 0, 1, 1], [], []>} : vector<16x32xbf16>, vector<32x32xbf16>, vector<16x32xf32> -> vector<16x32xf32>
    %119 = arith.addf %115, %118 : vector<16x32xf32>
    %c0_105 = arith.constant 0 : index
    %c0_106 = arith.constant 0 : index
    %120 = vector.load %arg9[%c0_105, %c0_106] : memref<1x32xf32, #tpu.memory_space<vmem>>, vector<1x32xf32>
    %121 = vector.broadcast %120 : vector<1x32xf32> to vector<16x32xf32>
    %122 = arith.addf %119, %121 : vector<16x32xf32>
    %123 = arith.negf %122 : vector<16x32xf32>
    %124 = math.exp %123 : vector<16x32xf32>
    %cst_107 = arith.constant 1.000000e+00 : f32
    %125 = vector.broadcast %cst_107 : f32 to vector<16x32xf32>
    %126 = arith.addf %125, %124 : vector<16x32xf32>
    %127 = arith.divf %125, %126 : vector<16x32xf32>
    %128 = arith.mulf %78, %3 : vector<16x32xf32>
    %129 = arith.truncf %128 : vector<16x32xf32> to vector<16x32xbf16>
    %c0_108 = arith.constant 0 : index
    %c0_109 = arith.constant 0 : index
    %c0_110 = arith.constant 0 : index
    %130 = vector.load %arg3[%c0_108, %c0_109, %c0_110] : memref<2x16x16xbf16, #tpu.memory_space<vmem>>, vector<1x16x16xbf16>
    %131 = vector.shape_cast %130 : vector<1x16x16xbf16> to vector<16x16xbf16>
    %cst_111 = arith.constant dense<0.000000e+00> : vector<16x32xf32>
    %132 = tpu.matmul %131, %129, %cst_111 {dimension_numbers = #tpu.dot_dimension_numbers<[1], [0], [0], [1], [0, 0, 1, 1], [], []>} : vector<16x16xbf16>, vector<16x32xbf16>, vector<16x32xf32> -> vector<16x32xf32>
    %133 = arith.truncf %132 : vector<16x32xf32> to vector<16x32xbf16>
    %cst_112 = arith.constant dense<0.000000e+00> : vector<16x32xf32>
    %134 = tpu.matmul %131, %133, %cst_112 {dimension_numbers = #tpu.dot_dimension_numbers<[1], [0], [0], [1], [0, 0, 1, 1], [], []>} : vector<16x16xbf16>, vector<16x32xbf16>, vector<16x32xf32> -> vector<16x32xf32>
    %135 = arith.truncf %134 : vector<16x32xf32> to vector<16x32xbf16>
    %c1_113 = arith.constant 1 : index
    %c0_114 = arith.constant 0 : index
    %c0_115 = arith.constant 0 : index
    %136 = vector.load %arg3[%c1_113, %c0_114, %c0_115] : memref<2x16x16xbf16, #tpu.memory_space<vmem>>, vector<1x16x16xbf16>
    %137 = vector.shape_cast %136 : vector<1x16x16xbf16> to vector<16x16xbf16>
    %cst_116 = arith.constant dense<0.000000e+00> : vector<16x32xf32>
    %138 = tpu.matmul %137, %129, %cst_116 {dimension_numbers = #tpu.dot_dimension_numbers<[1], [0], [0], [1], [0, 0, 1, 1], [], []>} : vector<16x16xbf16>, vector<16x32xbf16>, vector<16x32xf32> -> vector<16x32xf32>
    %139 = arith.truncf %138 : vector<16x32xf32> to vector<16x32xbf16>
    %cst_117 = arith.constant dense<0.000000e+00> : vector<16x32xf32>
    %140 = tpu.matmul %137, %139, %cst_117 {dimension_numbers = #tpu.dot_dimension_numbers<[1], [0], [0], [1], [0, 0, 1, 1], [], []>} : vector<16x16xbf16>, vector<16x32xbf16>, vector<16x32xf32> -> vector<16x32xf32>
    %141 = arith.truncf %140 : vector<16x32xf32> to vector<16x32xbf16>
    %cst_118 = arith.constant 0.000000e+00 : f32
    %142 = vector.broadcast %cst_118 : f32 to vector<16x32xf32>
    %c0_119 = arith.constant 0 : index
    %c0_120 = arith.constant 0 : index
    %c0_121 = arith.constant 0 : index
    %143 = vector.load %arg10[%c0_119, %c0_120, %c0_121] : memref<5x4x32xbf16, #tpu.memory_space<vmem>>, vector<1x4x32xbf16>
    %144 = vector.shape_cast %143 : vector<1x4x32xbf16> to vector<4x32xbf16>
    %cst_122 = arith.constant dense<0.000000e+00> : vector<16x32xf32>
    %145 = tpu.matmul %4, %144, %cst_122 {dimension_numbers = #tpu.dot_dimension_numbers<[1], [0], [0], [1], [0, 0, 1, 1], [], []>} : vector<16x4xbf16>, vector<4x32xbf16>, vector<16x32xf32> -> vector<16x32xf32>
    %146 = arith.addf %142, %145 : vector<16x32xf32>
    %c0_123 = arith.constant 0 : index
    %c0_124 = arith.constant 0 : index
    %c0_125 = arith.constant 0 : index
    %147 = vector.load %arg11[%c0_123, %c0_124, %c0_125] : memref<5x32x32xbf16, #tpu.memory_space<vmem>>, vector<1x32x32xbf16>
    %148 = vector.shape_cast %147 : vector<1x32x32xbf16> to vector<32x32xbf16>
    %cst_126 = arith.constant dense<0.000000e+00> : vector<16x32xf32>
    %149 = tpu.matmul %129, %148, %cst_126 {dimension_numbers = #tpu.dot_dimension_numbers<[1], [0], [0], [1], [0, 0, 1, 1], [], []>} : vector<16x32xbf16>, vector<32x32xbf16>, vector<16x32xf32> -> vector<16x32xf32>
    %150 = arith.addf %146, %149 : vector<16x32xf32>
    %c1_127 = arith.constant 1 : index
    %c0_128 = arith.constant 0 : index
    %c0_129 = arith.constant 0 : index
    %151 = vector.load %arg10[%c1_127, %c0_128, %c0_129] : memref<5x4x32xbf16, #tpu.memory_space<vmem>>, vector<1x4x32xbf16>
    %152 = vector.shape_cast %151 : vector<1x4x32xbf16> to vector<4x32xbf16>
    %cst_130 = arith.constant dense<0.000000e+00> : vector<16x32xf32>
    %153 = tpu.matmul %8, %152, %cst_130 {dimension_numbers = #tpu.dot_dimension_numbers<[1], [0], [0], [1], [0, 0, 1, 1], [], []>} : vector<16x4xbf16>, vector<4x32xbf16>, vector<16x32xf32> -> vector<16x32xf32>
    %154 = arith.addf %150, %153 : vector<16x32xf32>
    %c1_131 = arith.constant 1 : index
    %c0_132 = arith.constant 0 : index
    %c0_133 = arith.constant 0 : index
    %155 = vector.load %arg11[%c1_131, %c0_132, %c0_133] : memref<5x32x32xbf16, #tpu.memory_space<vmem>>, vector<1x32x32xbf16>
    %156 = vector.shape_cast %155 : vector<1x32x32xbf16> to vector<32x32xbf16>
    %cst_134 = arith.constant dense<0.000000e+00> : vector<16x32xf32>
    %157 = tpu.matmul %133, %156, %cst_134 {dimension_numbers = #tpu.dot_dimension_numbers<[1], [0], [0], [1], [0, 0, 1, 1], [], []>} : vector<16x32xbf16>, vector<32x32xbf16>, vector<16x32xf32> -> vector<16x32xf32>
    %158 = arith.addf %154, %157 : vector<16x32xf32>
    %c2_135 = arith.constant 2 : index
    %c0_136 = arith.constant 0 : index
    %c0_137 = arith.constant 0 : index
    %159 = vector.load %arg10[%c2_135, %c0_136, %c0_137] : memref<5x4x32xbf16, #tpu.memory_space<vmem>>, vector<1x4x32xbf16>
    %160 = vector.shape_cast %159 : vector<1x4x32xbf16> to vector<4x32xbf16>
    %cst_138 = arith.constant dense<0.000000e+00> : vector<16x32xf32>
    %161 = tpu.matmul %10, %160, %cst_138 {dimension_numbers = #tpu.dot_dimension_numbers<[1], [0], [0], [1], [0, 0, 1, 1], [], []>} : vector<16x4xbf16>, vector<4x32xbf16>, vector<16x32xf32> -> vector<16x32xf32>
    %162 = arith.addf %158, %161 : vector<16x32xf32>
    %c2_139 = arith.constant 2 : index
    %c0_140 = arith.constant 0 : index
    %c0_141 = arith.constant 0 : index
    %163 = vector.load %arg11[%c2_139, %c0_140, %c0_141] : memref<5x32x32xbf16, #tpu.memory_space<vmem>>, vector<1x32x32xbf16>
    %164 = vector.shape_cast %163 : vector<1x32x32xbf16> to vector<32x32xbf16>
    %cst_142 = arith.constant dense<0.000000e+00> : vector<16x32xf32>
    %165 = tpu.matmul %135, %164, %cst_142 {dimension_numbers = #tpu.dot_dimension_numbers<[1], [0], [0], [1], [0, 0, 1, 1], [], []>} : vector<16x32xbf16>, vector<32x32xbf16>, vector<16x32xf32> -> vector<16x32xf32>
    %166 = arith.addf %162, %165 : vector<16x32xf32>
    %c3_143 = arith.constant 3 : index
    %c0_144 = arith.constant 0 : index
    %c0_145 = arith.constant 0 : index
    %167 = vector.load %arg10[%c3_143, %c0_144, %c0_145] : memref<5x4x32xbf16, #tpu.memory_space<vmem>>, vector<1x4x32xbf16>
    %168 = vector.shape_cast %167 : vector<1x4x32xbf16> to vector<4x32xbf16>
    %cst_146 = arith.constant dense<0.000000e+00> : vector<16x32xf32>
    %169 = tpu.matmul %14, %168, %cst_146 {dimension_numbers = #tpu.dot_dimension_numbers<[1], [0], [0], [1], [0, 0, 1, 1], [], []>} : vector<16x4xbf16>, vector<4x32xbf16>, vector<16x32xf32> -> vector<16x32xf32>
    %170 = arith.addf %166, %169 : vector<16x32xf32>
    %c3_147 = arith.constant 3 : index
    %c0_148 = arith.constant 0 : index
    %c0_149 = arith.constant 0 : index
    %171 = vector.load %arg11[%c3_147, %c0_148, %c0_149] : memref<5x32x32xbf16, #tpu.memory_space<vmem>>, vector<1x32x32xbf16>
    %172 = vector.shape_cast %171 : vector<1x32x32xbf16> to vector<32x32xbf16>
    %cst_150 = arith.constant dense<0.000000e+00> : vector<16x32xf32>
    %173 = tpu.matmul %139, %172, %cst_150 {dimension_numbers = #tpu.dot_dimension_numbers<[1], [0], [0], [1], [0, 0, 1, 1], [], []>} : vector<16x32xbf16>, vector<32x32xbf16>, vector<16x32xf32> -> vector<16x32xf32>
    %174 = arith.addf %170, %173 : vector<16x32xf32>
    %c4_151 = arith.constant 4 : index
    %c0_152 = arith.constant 0 : index
    %c0_153 = arith.constant 0 : index
    %175 = vector.load %arg10[%c4_151, %c0_152, %c0_153] : memref<5x4x32xbf16, #tpu.memory_space<vmem>>, vector<1x4x32xbf16>
    %176 = vector.shape_cast %175 : vector<1x4x32xbf16> to vector<4x32xbf16>
    %cst_154 = arith.constant dense<0.000000e+00> : vector<16x32xf32>
    %177 = tpu.matmul %16, %176, %cst_154 {dimension_numbers = #tpu.dot_dimension_numbers<[1], [0], [0], [1], [0, 0, 1, 1], [], []>} : vector<16x4xbf16>, vector<4x32xbf16>, vector<16x32xf32> -> vector<16x32xf32>
    %178 = arith.addf %174, %177 : vector<16x32xf32>
    %c4_155 = arith.constant 4 : index
    %c0_156 = arith.constant 0 : index
    %c0_157 = arith.constant 0 : index
    %179 = vector.load %arg11[%c4_155, %c0_156, %c0_157] : memref<5x32x32xbf16, #tpu.memory_space<vmem>>, vector<1x32x32xbf16>
    %180 = vector.shape_cast %179 : vector<1x32x32xbf16> to vector<32x32xbf16>
    %cst_158 = arith.constant dense<0.000000e+00> : vector<16x32xf32>
    %181 = tpu.matmul %141, %180, %cst_158 {dimension_numbers = #tpu.dot_dimension_numbers<[1], [0], [0], [1], [0, 0, 1, 1], [], []>} : vector<16x32xbf16>, vector<32x32xbf16>, vector<16x32xf32> -> vector<16x32xf32>
    %182 = arith.addf %178, %181 : vector<16x32xf32>
    %c0_159 = arith.constant 0 : index
    %c0_160 = arith.constant 0 : index
    %183 = vector.load %arg12[%c0_159, %c0_160] : memref<1x32xf32, #tpu.memory_space<vmem>>, vector<1x32xf32>
    %184 = vector.broadcast %183 : vector<1x32xf32> to vector<16x32xf32>
    %185 = arith.addf %182, %184 : vector<16x32xf32>
    %186 = math.tanh %185 : vector<16x32xf32>
    %187 = arith.mulf %127, %3 : vector<16x32xf32>
    %cst_161 = arith.constant 1.000000e+00 : f32
    %188 = vector.broadcast %cst_161 : f32 to vector<16x32xf32>
    %189 = arith.subf %188, %127 : vector<16x32xf32>
    %190 = arith.mulf %189, %186 : vector<16x32xf32>
    %191 = arith.addf %187, %190 : vector<16x32xf32>
    %c0_162 = arith.constant 0 : index
    %c0_163 = arith.constant 0 : index
    %c0_164 = arith.constant 0 : index
    %192 = vector.load %arg13[%c0_162, %c0_163, %c0_164] : memref<1x16x32xf32, #tpu.memory_space<vmem>>, vector<1x16x32xf32>
    %193 = vector.shape_cast %192 : vector<1x16x32xf32> to vector<16x32xf32>
    %194 = vector.shape_cast %191 : vector<16x32xf32> to vector<1x16x32xf32>
    tpu.vector_store %arg13[%c0_162, %c0_163, %c0_164], %194 {strides = array<i32>} : memref<1x16x32xf32, #tpu.memory_space<vmem>>, vector<1x16x32xf32>,
    return
  }
  func.func @transform_0(%arg0: i32) -> (i32, i32, i32) {
    %c0_i32 = arith.constant 0 : i32
    %c0_i32_0 = arith.constant 0 : i32
    %c0_i32_1 = arith.constant 0 : i32
    return %arg0, %c0_i32, %c0_i32_0 : i32, i32, i32
  }
  func.func @transform_1(%arg0: i32) -> (i32, i32, i32) {
    %c0_i32 = arith.constant 0 : i32
    %c0_i32_0 = arith.constant 0 : i32
    %c0_i32_1 = arith.constant 0 : i32
    return %arg0, %c0_i32, %c0_i32_0 : i32, i32, i32
  }
  func.func @transform_2(%arg0: i32) -> (i32, i32, i32) {
    %c0_i32 = arith.constant 0 : i32
    %c0_i32_0 = arith.constant 0 : i32
    %c0_i32_1 = arith.constant 0 : i32
    %c0_i32_2 = arith.constant 0 : i32
    return %c0_i32, %c0_i32_0, %c0_i32_1 : i32, i32, i32
  }
  func.func @transform_3(%arg0: i32) -> (i32, i32, i32) {
    %c0_i32 = arith.constant 0 : i32
    %c0_i32_0 = arith.constant 0 : i32
    %c0_i32_1 = arith.constant 0 : i32
    %c0_i32_2 = arith.constant 0 : i32
    return %c0_i32, %c0_i32_0, %c0_i32_1 : i32, i32, i32
  }
  func.func @transform_4(%arg0: i32) -> (i32, i32, i32) {
    %c0_i32 = arith.constant 0 : i32
    %c0_i32_0 = arith.constant 0 : i32
    %c0_i32_1 = arith.constant 0 : i32
    %c0_i32_2 = arith.constant 0 : i32
    return %c0_i32, %c0_i32_0, %c0_i32_1 : i32, i32, i32
  }
  func.func @transform_5(%arg0: i32) -> (i32, i32) {
    %c0_i32 = arith.constant 0 : i32
    %c0_i32_0 = arith.constant 0 : i32
    %c0_i32_1 = arith.constant 0 : i32
    return %c0_i32, %c0_i32_0 : i32, i32
  }
  func.func @transform_6(%arg0: i32) -> (i32, i32, i32) {
    %c0_i32 = arith.constant 0 : i32
    %c0_i32_0 = arith.constant 0 : i32
    %c0_i32_1 = arith.constant 0 : i32
    %c0_i32_2 = arith.constant 0 : i32
    return %c0_i32, %c0_i32_0, %c0_i32_1 : i32, i32, i32
  }
  func.func @transform_7(%arg0: i32) -> (i32, i32, i32) {
    %c0_i32 = arith.constant 0 : i32
    %c0_i32_0 = arith.constant 0 : i32
    %c0_i32_1 = arith.constant 0 : i32
    %c0_i32_2 = arith.constant 0 : i32
    return %c0_i32, %c0_i32_0, %c0_i32_1 : i32, i32, i32
  }
  func.func @transform_8(%arg0: i32) -> (i32, i32) {
    %c0_i32 = arith.constant 0 : i32
    %c0_i32_0 = arith.constant 0 : i32
    %c0_i32_1 = arith.constant 0 : i32
    return %c0_i32, %c0_i32_0 : i32, i32
  }
  func.func @transform_9(%arg0: i32) -> (i32, i32, i32) {
    %c0_i32 = arith.constant 0 : i32
    %c0_i32_0 = arith.constant 0 : i32
    %c0_i32_1 = arith.constant 0 : i32
    %c0_i32_2 = arith.constant 0 : i32
    return %c0_i32, %c0_i32_0, %c0_i32_1 : i32, i32, i32
  }
  func.func @transform_10(%arg0: i32) -> (i32, i32, i32) {
    %c0_i32 = arith.constant 0 : i32
    %c0_i32_0 = arith.constant 0 : i32
    %c0_i32_1 = arith.constant 0 : i32
    %c0_i32_2 = arith.constant 0 : i32
    return %c0_i32, %c0_i32_0, %c0_i32_1 : i32, i32, i32
  }
  func.func @transform_11(%arg0: i32) -> (i32, i32) {
    %c0_i32 = arith.constant 0 : i32
    %c0_i32_0 = arith.constant 0 : i32
    %c0_i32_1 = arith.constant 0 : i32
    return %c0_i32, %c0_i32_0 : i32, i32
  }
  func.func @transform_12(%arg0: i32) -> (i32, i32, i32) {
    %c0_i32 = arith.constant 0 : i32
    %c0_i32_0 = arith.constant 0 : i32
    %c0_i32_1 = arith.constant 0 : i32
    return %arg0, %c0_i32, %c0_i32_0 : i32, i32, i32
  }
}

</mosaic_0001>

<bundles_post_ra>
// kernel: tpu_custom_call.1
= control target key start
LH: loop header
LB: loop body
LE: loop exit
PB: predicated region body
PF: predicated region fallthrough
CT: control target
= control target key end

     0   :  { %s4460_s0 = inlined_call_operand.vmem [shape: f32[2,16,4], index: 0, kind: input, shape index: {}]   ;;  %s4461_s1 = inlined_call_operand.vmem [shape: f32[2,16,32], index: 1, kind: input, shape index: {}]   ;;  %s4462_s2 = inlined_call_operand.hbm [shape: bf16[2,16,16], index: 2, kind: input, shape index: {}]   ;;  %s4463_s3 = inlined_call_operand.vmem [shape: bf16[5,4,32], index: 3, kind: input, shape index: {}]   ;;  %s4464_s4 = inlined_call_operand.hbm [shape: bf16[5,32,32], index: 4, kind: input, shape index: {}]   ;;  %s4465_s5 = inlined_call_operand.hbm [shape: f32[1,32], index: 5, kind: input, shape index: {}]   ;;  %s4466_s6 = inlined_call_operand.hbm [shape: bf16[5,4,32], index: 6, kind: input, shape index: {}]   ;;  %s4467_s7 = inlined_call_operand.hbm [shape: bf16[5,32,32], index: 7, kind: input, shape index: {}]   ;;  %s4468_s8 = inlined_call_operand.vmem [shape: f32[1,32], index: 8, kind: input, shape index: {}]   ;;  %s4469_s9 = inlined_call_operand.vmem [shape: bf16[5,4,32], index: 9, kind: input, shape index: {}]   ;;  %s4470_s10 = inlined_call_operand.hbm [shape: bf16[5,32,32], index: 10, kind: input, shape index: {}]   ;;  %s4471_s11 = inlined_call_operand.vmem [shape: f32[1,32], index: 11, kind: input, shape index: {}]   ;;  %s4472_s12 = inlined_call_operand.hbm [shape: f32[2,16,32], index: 12, kind: output, shape index: {}]  }
   0x1   :  { %4483 = sst [smem:[#allocation24_spill]] %s4462_s2 }
   0x2   :  { %17 = vsyncpa [#allocation3], 0 }
   0x3   :  { %18 = vsyncpa [#allocation6], 0 }
   0x4   :  { %19 = vsyncpa [#allocation9], 0 }
   0x5   :  { %20 = vsyncpa [#allocation12], 0 }
   0x6   :  { %21 = vsyncpa [#allocation4], 0 }
   0x7   :  { %23 = vsyncpa [#allocation4 + $0x1], 0  ;;  %s3890_s21 = smov 0   ;;  %s3892_s22 = smov 0  }
   0x8   :  { %s3894_s23 = smov 0   ;;  %s3896_s24 = smov 0  }
   0x9 LB: > { %4484 = sst [smem:[#allocation19_spill]] %s3796_s21  ;;  %s3911_s25 = sadd.s32 4294967295, %s3808_s24   ;;  %s3808_s24 = sphi %s3896_s24, %s4508_s24   ;;  %s3804_s23 = sphi %s3894_s23, %s4510_s23   ;;  %s3800_s22 = sphi %s3892_s22, %s4512_s22   ;;  %s3796_s21 = sphi %s3890_s21, %s4511_s21  }
   0xa   : > { %4485 = sst [smem:[#allocation20_spill]] %s3804_s23  ;;  %s2915_s26 = sadd.s32 4294967294, %s3808_s24  }
   0xb   : > { %s3915_s27 = sadd.s32 1, %s3808_s24   ;;  %s298_s28 = sadd.s32 1, %s3804_s23 }
   0xc   : > { %4486 = sst [smem:[#allocation21_spill]] %s3915_s27  ;;  %s295_s29 = ssub.s32 %s3808_s24, %s3915_s27 }
   0xd   : > { %p308_p0 = scmp.ne.s32.totalorder %s3804_s23, %s3800_s22  ;;  %p296_p1 = scmp.eq.s32.totalorder %s295_s29, 0 }
   0xe   : > { %p309_p2 = scmp.eq.s32.totalorder %s3911_s25, 1  ;;  %p314_p3 = scmp.ne.s32.totalorder %s3800_s22, %s3796_s21 }
   0xf   : > { %p315_p4 = scmp.eq.s32.totalorder %s2915_s26, 1  ;;  %p2916_p7 = scmp.ge.s32.totalorder %s3808_s24, 1 }
  0x10   : > { %s3926_s30 = scalar_select %p296_p1, %s3804_s23, %s298_s28  }
  0x11   : > { %p3928_p5 = por %p309_p2, %p308_p0  ;;  %p3932_p6 = por %p315_p4, %p314_p3 }
  0x12   : > { %4487 = sst [smem:[#allocation22_spill]] %s3926_s30  ;;  %p322_p8 = scmp.lt.s32.totalorder %s3808_s24, 3 }
  0x13   : > { %s4489_s14 = scalar_select %p3932_p6, 1, 0 }
  0x14   : > { %p4482_p9 = scmp.eq.s32.totalorder %s3911_s25, 0  ;;  %p3939_p10 = pnand %p2916_p7, %p322_p8 }
  0x15   : > { %4490 = sst [smem:[#allocation23_spill]] %s4489_s14  ;;  %s3810_s16 = smov [#allocation5]  }
  0x16   : > { %p3440_p11 = pneg %p3939_p10  ;;  %s350_s17 = sshll.u32 %s3810_s16, 4  ;;  %s351_s17 = int_to_ptr.vmem [resolvable:$true] %s350_s17 }
  0x17   : > { %s3811_s19 = smov [#allocation8]   ;;  %s3587_s28 = scalar_lea.vmem %s351_s17, 1280 }
  0x18   : > { %p3947_p12 = pnand %p4482_p9, %p3440_p11  ;;  %s374_s20 = sshll.u32 %s3811_s19, 4  ;;  %s375_s20 = int_to_ptr.vmem [resolvable:$true] %s374_s20 }
  0x19   : > { %p3588_p0 = scmp.ne.s32.totalorder %s351_s17, %s3587_s28  ;;  %p3595_p3 = scmp.lt.s32.totalorder %s351_s17, %s351_s17 }
  0x1a   : > { %p3953_p13 = pneg %p3947_p12  ;;  %p3596_p4 = scmp.lt.s32.totalorder %s3587_s28, %s3587_s28 }
  0x1c   : > { %p3590_p1 = pnand %p3588_p0, %p3953_p13  ;;  %p3597_p7 = por %p3596_p4, %p3595_p3 }
  0x1e   : > { %p3591_p2 = pneg %p3590_p1 }
  0x20   : > { %p3598_p8 = pnand %p3597_p7, %p3591_p2 }
  0x22   : > { %3601 = shalt.err (!%p3598_p8)
}
  0x23   : > { %s4478_s29 = smov 64   ;;  %s4480_s16 = smov 4  }
  0x24   : > { %3446 = dma.hbm_to_vmem [thread:$0]  (!%p3947_p12), %s4464_s4, 1280, %s351_s17, [#allocation6], %s4478_s29, %s4478_s29, %s4480_s16  }
  0x25   : > { %s3613_s23 = scalar_lea.vmem %s375_s20, 160  ;;  %p3621_p3 = scmp.lt.s32.totalorder %s375_s20, %s375_s20 }
  0x26   : > { %p3614_p11 = scmp.ne.s32.totalorder %s375_s20, %s3613_s23  ;;  %p3622_p2 = scmp.lt.s32.totalorder %s3613_s23, %s3613_s23 }
  0x28   : > { %p3616_p0 = pnand %p3614_p11, %p3953_p13  ;;  %p3623_p4 = por %p3622_p2, %p3621_p3 }
  0x2a   : > { %p3617_p1 = pneg %p3616_p0 }
  0x2c   : > { %p3624_p7 = pnand %p3623_p4, %p3617_p1 }
  0x2e   : > { %3627 = shalt.err (!%p3624_p7)
}
  0x2f   : > { %s3814_s28 = smov 32   ;;  %s3815_s27 = smov 2  }
  0x30   : > { %3452 = dma.hbm_to_vmem [thread:$0]  (!%p3947_p12), %s4466_s6, 160, %s375_s20, [#allocation9], %s3814_s28, %s3814_s28, %s3815_s27  }
  0x31   : > { %s3816_s30 = smov [#allocation2]   ;;  %s3817_s19 = smov [#allocation7]  }
  0x32   : > { %s334_s17 = sshll.u32 %s3816_s30, 4  ;;  %s364_s29 = sshll.u32 %s3817_s19, 4  ;;  %s335_s17 = int_to_ptr.vmem [resolvable:$true] %s334_s17  ;;  %s365_s29 = int_to_ptr.vmem [resolvable:$true] %s364_s29 }
  0x33   : > { %s3639_s16 = scalar_lea.vmem %s335_s17, 256  ;;  %p3647_p1 = scmp.lt.s32.totalorder %s335_s17, %s335_s17 }
  0x34   : > { %p3640_p8 = scmp.ne.s32.totalorder %s335_s17, %s3639_s16  ;;  %p3648_p3 = scmp.lt.s32.totalorder %s3639_s16, %s3639_s16 }
  0x36   : > { %p3642_p11 = pnand %p3640_p8, %p3953_p13  ;;  %p3649_p2 = por %p3648_p3, %p3647_p1 }
  0x38   : > { %p3643_p0 = pneg %p3642_p11 }
  0x3a   : > { %p3650_p4 = pnand %p3649_p2, %p3643_p0 }
  0x3c   : > { %3653 = shalt.err (!%p3650_p4)
}
  0x3d   : > { %s4494_s21 = smov 4   ;;  %s4495_s23 = smov 64  }
  0x3e   : > { %s4496_s2 = sld [smem:[#allocation24_spill]]  ;;  %s3665_s20 = scalar_lea.vmem %s365_s29, 16 }
  0x3f   : > { %p3666_p7 = scmp.ne.s32.totalorder %s365_s29, %s3665_s20  ;;  %s3672_s28 = scalar_lea.vmem %s365_s29, 32 }
  0x40   : > { %p3673_p9 = scmp.lt.s32.totalorder %s365_s29, %s365_s29  ;;  %p3674_p1 = scmp.lt.s32.totalorder %s3672_s28, %s3665_s20 }
  0x41   : > { %p3668_p8 = pnand %p3666_p7, %p3953_p13 }
  0x42   : > { %p3675_p0 = por %p3674_p1, %p3673_p9 }
  0x43   : > { %p3669_p11 = pneg %p3668_p8 }
  0x44   : > { %3443 = dma.hbm_to_vmem [thread:$0]  (!%p3947_p12), %s4496_s2, 256, %s335_s17, [#allocation3], %s4495_s23, %s4495_s23, %s4494_s21  }
  0x45   : > { %p3676_p3 = pnand %p3675_p0, %p3669_p11 }
  0x47   : > { %3679 = shalt.err (!%p3676_p3)
}
  0x48   : > { %3449 = dma.hbm_to_vmem [thread:$0]  (!%p3947_p12), %s4465_s5, 16, %s365_s29, [#allocation6]  }
  0x49   : > { %s3818_s19 = smov [#allocation10]   ;;  %s3819_s27 = smov [#allocation11]  }
  0x4a   : > { %s387_s17 = sshll.u32 %s3818_s19, 4  ;;  %s406_s14 = sshll.u32 %s3819_s27, 4  ;;  %s388_s17 = int_to_ptr.vmem [resolvable:$true] %s387_s17  ;;  %s407_s14 = int_to_ptr.vmem [resolvable:$true] %s406_s14 }
  0x4b   : > { %s3691_s2 = scalar_lea.vmem %s388_s17, 1280  ;;  %p3699_p7 = scmp.lt.s32.totalorder %s388_s17, %s388_s17 }
  0x4c   : > { %p3692_p2 = scmp.ne.s32.totalorder %s388_s17, %s3691_s2  ;;  %p3700_p8 = scmp.lt.s32.totalorder %s3691_s2, %s3691_s2 }
  0x4e   : > { %p3694_p4 = pnand %p3692_p2, %p3953_p13  ;;  %p3701_p11 = por %p3700_p8, %p3699_p7 }
  0x50   : > { %p3695_p9 = pneg %p3694_p4 }
  0x52   : > { %p3702_p1 = pnand %p3701_p11, %p3695_p9 }
  0x54   : > { %3705 = shalt.err (!%p3702_p1)
}
  0x55   : > { %3455 = dma.hbm_to_vmem [thread:$0]  (!%p3947_p12), %s4467_s7, 1280, %s388_s17, [#allocation9], %s4495_s23, %s4495_s23, %s4494_s21  }
  0x56   : > { %s3717_s28 = scalar_lea.vmem %s407_s14, 1280  ;;  %p3725_p4 = scmp.lt.s32.totalorder %s407_s14, %s407_s14 }
  0x57   : > { %p3718_p0 = scmp.ne.s32.totalorder %s407_s14, %s3717_s28  ;;  %p3726_p6 = scmp.lt.s32.totalorder %s3717_s28, %s3717_s28 }
  0x59   : > { %p3720_p3 = pnand %p3718_p0, %p3953_p13  ;;  %p3727_p7 = por %p3726_p6, %p3725_p4 }
  0x5b   : > { %p3721_p2 = pneg %p3720_p3 }
  0x5d   : > { %p3728_p9 = pnand %p3727_p7, %p3721_p2 }
  0x5f   : > { %3731 = shalt.err (!%p3728_p9)
}
  0x60   : > { %3458 = dma.hbm_to_vmem [thread:$0]  (!%p3947_p12), %s4470_s10, 1280, %s407_s14, [#allocation12], %s4495_s23, %s4495_s23, %s4494_s21  }
  0x61   : > { %441 = sbr.rel (%p3939_p10) target bundleno = 1448 (0x5a8), region = 68  ;;  %p4497_p13 = scmp.eq.s32.totalorder (!%p3939_p10), %s3911_s25, 0 }
  0x66   : > { %3775 = dma.done.wait (%p4497_p13), [#allocation3], 256   ;;  %p4498_p8 = pmov %p4497_p13 }
  0x68   : > { %3777 = vsyncadd (%p4498_p8), [#allocation3], 4294967040  ;;  %p4499_p6 = pmov %p4498_p8 }
  0x6a   : > { %3779 = dma.done.wait (%p4499_p6), [#allocation6], 1296   ;;  %p4500_p11 = pmov %p4499_p6 }
  0x6b   : > { %p4501_p1 = pmov %p4499_p6 }
  0x6c   : > { %3781 = vsyncadd (%p4500_p11), [#allocation6], 4294966000 }
  0x6d   : > { %3783 = dma.done.wait (%p4501_p1), [#allocation9], 1440   ;;  %p4502_p12 = pmov %p4501_p1 }
  0x6e   : > { %p4503_p10 = pmov %p4501_p1 }
  0x6f   : > { %3785 = vsyncadd (%p4502_p12), [#allocation9], 4294965856 }
  0x70   : > { %3787 = dma.done.wait (%p4503_p10), [#allocation12], 1280   ;;  %p4504_p0 = pmov %p4501_p1 }
  0x71   : > { %p508_p3 = scmp.lt.s32.totalorder %s3911_s25, 1  ;;  %v3820_v0 = vmov 0.0   ;;  %vm3821_vm0 = vmmov 0   ;;  %v4042_v4 = vld [vmem:[#allocation2] sm:$0xff]   ;;  %vm531_vm1 = vcmask 130048   ;;  %v4062_v7 = vld [vmem:[#allocation2 + $0x8] sm:$0xff]  }
  0x72   : > { %3789 = vsyncadd (%p4504_p0), [#allocation12], 4294966016  ;;  %3132 = vmatprep.subr.bf16.mxu0 %v3820_v0  ;;  %3134 = vmatprep.mubr.msk.bf16.mxu0 %vm3821_vm0, %v3820_v0  ;;  %v3524_v9 = vld [vmem:[#allocation5 + $0x8] sm:$0xff]   ;;  %v3525_v10 = vld [vmem:[#allocation5] sm:$0xff]   ;;  %vm900_vm2 = vcmask 261120   ;;  %vm949_vm3 = vcmask 1041408  }
  0x73   : > { %s509_s15 = scalar_select %p508_p3, %s3911_s25, 1  ;;  %3138 = vmatprep.subr.bf16.mxu1 %v3820_v0  ;;  %3140 = vmatprep.mubr.msk.bf16.mxu1 %vm3821_vm0, %v3820_v0  ;;  %v2950_v11 = vld [vmem:[%s4463_s3 + $0x2] sm:$0x3]  ;;  %vm945_vm4 = vcmask 31744   ;;  %v883_v32 = vld [vmem:[%s4463_s3] sm:$0x3] }
  0x74   : > { %v1000_v12 = vsel %vm949_vm3, %v2950_v11, 0  ;;  %v951_v34 = vsel %vm949_vm3, %v883_v32, 0  ;;  %v3526_v39 = vld [vmem:[#allocation5 + $0x18] sm:$0xff]   ;;  %v3527_v40 = vld [vmem:[#allocation5 + $0x10] sm:$0xff]   ;;  %v3528_v43 = vld [vmem:[#allocation5 + $0x28] sm:$0xff]   ;;  %s505_s21 = sand.u32 1, %s3800_s22  }
  0x75   : > { %s3030_s18 = sshll.u32 %s509_s15, 4  ;;  %v2955_v41 = vld [vmem:[%s4463_s3 + $0x4] sm:$0x3]  ;;  %v3529_v44 = vld [vmem:[#allocation5 + $0x20] sm:$0xff]   ;;  %v2960_v50 = vld [vmem:[%s4463_s3 + $0x6] sm:$0x3] }
  0x76   : > { %s512_s23 = scalar_lea.vmem %s4460_s0, %s3030_s18  ;;  %s4048_s17 = scalar_lea.vmem %s4461_s1, %s3030_s18  ;;  %v1114_v42 = vsel %vm949_vm3, %v2955_v41, 0  ;;  %v1228_v54 = vsel %vm949_vm3, %v2960_v50, 0  ;;  %v2965_v58 = vld [vmem:[%s4463_s3 + $0x8] sm:$0x3]  ;;  %v3538_v50 = vld [vmem:[#allocation10 + $0x28] sm:$0xff]  }
  0x77   : > { %v519_v1 = vld [vmem:[%s512_s23] sm:$0xff]  ;;  %v520_v2 = vld [vmem:[%s512_s23 + $0x8] sm:$0xff]  ;;  %v1342_v60 = vsel %vm949_vm3, %v2965_v58, 0  ;;  %s2931_s23 = sshll.u32 %s505_s21, 4  ;;  %s3032_s30 = sshll.u32 %s3911_s25, 8 }
  0x78   : > { %v4040_v3 = vpack.c.bf16 %v520_v2, %v519_v1  ;;  %v4054_v5 = vld [vmem:[%s4048_s17] sm:$0xff]  ;;  %v4057_v6 = vld [vmem:[%s4048_s17 + $0x8] sm:$0xff]  ;;  %s507_s19 = scalar_lea.vmem [#allocation13], %s2931_s23  ;;  %s4415_s20 = scalar_lea.hbm %s4472_s12, %s3032_s30 }
  0x79   : > { %v4067_v8 = vpack.c.bf16 %v4057_v6, %v4054_v5  ;;  %v3530_v2 = vld [vmem:[#allocation5 + $0x38] sm:$0xff]   ;;  %s2781_s27 = sshll.u32 %s507_s19, 4  ;;  %s4420_s25 = scalar_lea.sflag [#allocation4], %s505_s21  ;;  %s4417_s27 = int_to_ptr.vmem [resolvable:$true] %s2781_s27 }
  0x7a   : > { %3133 = vmatpush3.bf16.msra.mxu0 %v4040_v3  ;;  %s3822_s28 = smov [#allocation13]  }
  0x7b   : > { %3144 = vmatprep.subr.bf16.mxu0 %v3820_v0  ;;  %s3736_s2 = sshll.u32 %s3822_s28, 4  ;;  %s3737_s2 = int_to_ptr.vmem [resolvable:$false] %s3736_s2 }
  0x7c   : > { %s3738_s16 = scalar_lea.vmem %s3737_s2, 512  ;;  %p3739_p9 = scmp.lt.s32.totalorder %s4417_s27, %s3737_s2 }
  0x7d   : > { %3135 = vmatmul.mubr.msk.bf16.vlgmr.msra.gmra.mxu0 %vm531_vm1, %v4042_v4 }
  0x7e   : > { %3145 = vmatpush3.bf16.msra.mxu0 %v4040_v3  ;;  %3146 = vmatprep.mubr.msk.bf16.mxu0 %vm3821_vm0, %v3820_v0 }
  0x7f   : > { %3156 = vmatprep.subr.bf16.mxu0 %v3820_v0 }
  0x85   : > { %3147 = vmatmul.mubr.msk.bf16.vlgmr.msra.gmra.mxu0 %vm531_vm1, %v4062_v7 }
  0x86   : > { %3157 = vmatpush3.bf16.msra.mxu0 %v4067_v8  ;;  %3158 = vmatprep.mubr.msk.bf16.mxu0 %vm3821_vm0, %v3820_v0 }
  0x87   : > { %3168 = vmatprep.subr.bf16.mxu0 %v3820_v0 }
  0x8d   : > { %3159 = vmatmul.mubr.msk.bf16.vlgmr.msra.gmra.mxu0 %vm531_vm1, %v4042_v4 }
  0x8e   : > { %3169 = vmatpush3.bf16.msra.mxu0 %v4067_v8  ;;  %3170 = vmatprep.mubr.msk.bf16.mxu0 %vm3821_vm0, %v3820_v0 }
  0x8f   : > { %3180 = vmatprep.subr.bf16.mxu0 %v3820_v0 }
  0x95   : > { %3171 = vmatmul.mubr.msk.bf16.vlgmr.msra.gmra.mxu0 %vm531_vm1, %v4062_v7 }
  0x96   : > { %3181 = vmatpush3.bf16.msra.mxu0 %v3524_v9  ;;  %3184 = vmatprep.mubr.msk.bf16.mxu0 %vm3821_vm0, %v3820_v0  ;;  %v3531_v9 = vld [vmem:[#allocation10 + $0x8] sm:$0xff]  }
  0x97   : > { %3182 = vmatprep.subr.bf16.mxu0 %v3820_v0 }
  0x9a   : > { %3183 = vmatpush3.bf16.msra.mxu0 %v3525_v10 }
  0x9b   : > { %3194 = vmatprep.subr.bf16.mxu0 %v3820_v0 }
  0x9d   : > { %3185 = vmatmul.mubr.msk.bf16.vlgmr.msra.gmra.mxu0 %vm900_vm2, %v4067_v8 }
  0x9e   : > { %3196 = vmatprep.mubr.msk.bf16.mxu0 %vm3821_vm0, %v3820_v0  ;;  %3195 = vmatpush3.bf16.msra.mxu0 %v1000_v12 }
  0x9f   : > { %3208 = vmatprep.subr.bf16.mxu0 %v3820_v0 }
 0x13d   : > { %v569_v13 = vpop.f32.mrf.mxu0 }
 0x13f   : > { %v3136_v14 = vpop.f32.mrf.mxu0 }
 0x140   : > { %v3532_v14 = vld [vmem:[#allocation5 + $0x30] sm:$0xff]  }
 0x141   : > { %v572_v15 = vpop.f32.mrf.mxu0 }
 0x142   : > { %v4096_v16 = vpack.c.bf16 %v572_v15, %v569_v13  ;;  %v3533_v15 = vld [vmem:[#allocation10] sm:$0xff]  }
 0x143   : > { %v3137_v17 = vpop.f32.mrf.mxu0 }
 0x144   : > { %3139 = vmatpush3.bf16.msra.mxu1 %v4096_v16  ;;  %3197 = vmatmul.mubr.msk.bf16.vlgmr.msra.gmra.mxu0 %vm945_vm4, %v4096_v16 }
 0x145   : > { %v664_v18 = vpop.f32.mrf.mxu0  ;;  %3150 = vmatprep.subr.bf16.mxu1 %v3820_v0  ;;  %3210 = vmatprep.mubr.msk.bf16.mxu0 %vm3821_vm0, %v3820_v0 }
 0x146   : > { %3209 = vmatpush3.bf16.msra.mxu0 %v1114_v42  ;;  %v1790_v42 = vld [vmem:[#allocation8 + $0x6] sm:$0x3] }
 0x147   : > { %3141 = vmatmul.mubr.msk.bf16.vlgmr.msra.gmra.mxu1 %vm531_vm1, %v4042_v4  ;;  %v3148_v19 = vpop.f32.mrf.mxu0  ;;  %3222 = vmatprep.subr.bf16.mxu0 %v3820_v0 }
 0x148   : > { %3152 = vmatprep.mubr.msk.bf16.mxu1 %vm3821_vm0, %v3820_v0 }
 0x149   : > { %v667_v20 = vpop.f32.mrf.mxu0 }
 0x14a   : > { %v4108_v21 = vpack.c.bf16 %v667_v20, %v664_v18  ;;  %v1574_v18 = vld [vmem:[#allocation8 + $0x2] sm:$0x3]  ;;  %v3534_v20 = vld [vmem:[#allocation5 + $0x48] sm:$0xff]  }
 0x14b   : > { %v3149_v22 = vpop.f32.mrf.mxu0 }
 0x14c   : > { %3151 = vmatpush3.bf16.msra.mxu1 %v4108_v21  ;;  %v1576_v22 = vsel %vm949_vm3, %v1574_v18, 0 }
 0x14d   : > { %v749_v23 = vpop.f32.mrf.mxu0  ;;  %3162 = vmatprep.subr.bf16.mxu1 %v3820_v0 }
 0x14f   : > { %3153 = vmatmul.mubr.msk.bf16.vlgmr.msra.gmra.mxu1 %vm531_vm1, %v4062_v7  ;;  %v3160_v24 = vpop.f32.mrf.mxu0 }
 0x150   : > { %3164 = vmatprep.mubr.msk.bf16.mxu1 %vm3821_vm0, %v3820_v0 }
 0x151   : > { %v752_v25 = vpop.f32.mrf.mxu0 }
 0x152   : > { %v4116_v26 = vpack.c.bf16 %v752_v25, %v749_v23  ;;  %v3535_v25 = vld [vmem:[#allocation5 + $0x40] sm:$0xff]  }
 0x153   : > { %v3161_v27 = vpop.f32.mrf.mxu0 }
 0x154   : > { %3163 = vmatpush3.bf16.msra.mxu1 %v4116_v26 }
 0x155   : > { %v833_v28 = vpop.f32.mrf.mxu0  ;;  %3174 = vmatprep.subr.bf16.mxu1 %v3820_v0 }
 0x157   : > { %3165 = vmatmul.mubr.msk.bf16.vlgmr.msra.gmra.mxu1 %vm531_vm1, %v4042_v4  ;;  %v3172_v29 = vpop.f32.mrf.mxu0 }
 0x158   : > { %3176 = vmatprep.mubr.msk.bf16.mxu1 %vm3821_vm0, %v3820_v0  ;;  %v1471_v29 = vld [vmem:[#allocation8] sm:$0x3] }
 0x159   : > { %v836_v30 = vpop.f32.mrf.mxu0 }
 0x15a   : > { %v4124_v31 = vpack.c.bf16 %v836_v30, %v833_v28  ;;  %v1682_v30 = vld [vmem:[#allocation8 + $0x4] sm:$0x3] }
 0x15b   : > { %v3173_v33 = vpop.f32.mrf.mxu0 }
 0x15c   : > { %3175 = vmatpush3.bf16.msra.mxu1 %v4124_v31 }
 0x15d   : > { %3188 = vmatprep.subr.bf16.mxu1 %v3820_v0  ;;  %v4132_v35 = vpop.f32.mrf.mxu0 }
 0x15f   : > { %3177 = vmatmul.mubr.msk.bf16.vlgmr.msra.gmra.mxu1 %vm531_vm1, %v4062_v7  ;;  %v3186_v36 = vpop.f32.mrf.mxu0 }
 0x160   : > { %3189 = vmatpush3.bf16.msra.mxu1 %v951_v34  ;;  %3190 = vmatprep.mubr.msk.bf16.mxu1 %vm3821_vm0, %v3820_v0  ;;  %v1684_v36 = vsel %vm949_vm3, %v1682_v30, 0 }
 0x161   : > { %3200 = vmatprep.subr.bf16.mxu1 %v3820_v0  ;;  %v4139_v37 = vpop.f32.mrf.mxu0 }
 0x163   : > { %v3187_v38 = vpop.f32.mrf.mxu0 }
 0x167   : > { %3191 = vmatmul.mubr.msk.bf16.vlgmr.msra.gmra.mxu1 %vm945_vm4, %v4040_v3 }
 0x168   : > { %3201 = vmatpush3.bf16.msra.mxu1 %v3526_v39  ;;  %3204 = vmatprep.mubr.msk.bf16.mxu1 %vm3821_vm0, %v3820_v0 }
 0x169   : > { %3202 = vmatprep.subr.bf16.mxu1 %v3820_v0 }
 0x16c   : > { %3203 = vmatpush3.bf16.msra.mxu1 %v3527_v40 }
 0x16d   : > { %3214 = vmatprep.subr.bf16.mxu1 %v3820_v0 }
 0x16f   : > { %3205 = vmatmul.mubr.msk.bf16.vlgmr.msra.gmra.mxu1 %vm900_vm2, %v4116_v26 }
 0x170   : > { %3218 = vmatprep.mubr.msk.bf16.mxu1 %vm3821_vm0, %v3820_v0  ;;  %3215 = vmatpush3.bf16.msra.mxu1 %v3528_v43 }
 0x171   : > { %3216 = vmatprep.subr.bf16.mxu1 %v3820_v0 }
 0x174   : > { %3217 = vmatpush3.bf16.msra.mxu1 %v3529_v44  ;;  %v3536_v44 = vld [vmem:[#allocation10 + $0x18] sm:$0xff]  }
 0x175   : > { %3228 = vmatprep.subr.bf16.mxu1 %v3820_v0 }
 0x204   : > { %v4158_v45 = vpop.f32.mrf.mxu0 }
 0x206   : > { %v3198_v46 = vpop.f32.mrf.mxu0 }
 0x207   : > { %v611_v47 = vpop.f32.mrf.mxu1  ;;  %v1792_v46 = vsel %vm949_vm3, %v1790_v42, 0 }
 0x208   : > { %v4160_v48 = vpop.f32.mrf.mxu0 }
 0x209   : > { %v3142_v49 = vpop.f32.mrf.mxu1 }
 0x20a   : > { %v3199_v51 = vpop.f32.mrf.mxu0  ;;  %v1898_v49 = vld [vmem:[#allocation8 + $0x8] sm:$0x3] }
 0x20b   : > { %v614_v52 = vpop.f32.mrf.mxu1  ;;  %v1900_v51 = vsel %vm949_vm3, %v1898_v49, 0 }
 0x20c   : > { %v4165_v53 = vpack.c.bf16 %v614_v52, %v611_v47  ;;  %v3539_v52 = vld [vmem:[#allocation10 + $0x20] sm:$0xff]  }
 0x20d   : > { %v3143_v55 = vpop.f32.mrf.mxu1 }
 0x20e   : > { %3211 = vmatmul.mubr.msk.bf16.vlgmr.msra.gmra.mxu0 %vm945_vm4, %v4165_v53  ;;  %v3542_v55 = vld [vmem:[#allocation10 + $0x48] sm:$0xff]  }
 0x20f   : > { %v706_v56 = vpop.f32.mrf.mxu1  ;;  %3223 = vmatpush3.bf16.msra.mxu0 %v1228_v54  ;;  %3224 = vmatprep.mubr.msk.bf16.mxu0 %vm3821_vm0, %v3820_v0  ;;  %v3540_v54 = vld [vmem:[#allocation10 + $0x38] sm:$0xff]  }
 0x210   : > { %3236 = vmatprep.subr.bf16.mxu0 %v3820_v0 }
 0x211   : > { %v3154_v57 = vpop.f32.mrf.mxu1 }
 0x213   : > { %v709_v59 = vpop.f32.mrf.mxu1 }
 0x214   : > { %v4182_v10 = vpack.c.bf16 %v709_v59, %v706_v56  ;;  %v3543_v56 = vld [vmem:[#allocation10 + $0x40] sm:$0xff]  }
 0x215   : > { %v3155_v61 = vpop.f32.mrf.mxu1 }
 0x216   : > { %3225 = vmatmul.mubr.msk.bf16.vlgmr.msra.gmra.mxu0 %vm945_vm4, %v4108_v21 }
 0x217   : > { %v791_v62 = vpop.f32.mrf.mxu1  ;;  %3237 = vmatpush3.bf16.msra.mxu0 %v1342_v60  ;;  %3238 = vmatprep.mubr.msk.bf16.mxu0 %vm3821_vm0, %v3820_v0 }
 0x218   : > { %3250 = vmatprep.subr.bf16.mxu0 %v3820_v0 }
 0x219   : > { %v3166_v63 = vpop.f32.mrf.mxu1 }
 0x21b   : > { %v794_v1 = vpop.f32.mrf.mxu1 }
 0x21c   : > { %v4184_v11 = vpack.c.bf16 %v794_v1, %v791_v62 }
 0x21d   : > { %v3167_v12 = vpop.f32.mrf.mxu1 }
 0x21e   : > { %3219 = vmatmul.mubr.msk.bf16.vlgmr.msra.gmra.mxu1 %vm900_vm2, %v4184_v11  ;;  %3239 = vmatmul.mubr.msk.bf16.vlgmr.msra.gmra.mxu0 %vm945_vm4, %v4182_v10 }
 0x21f   : > { %v875_v13 = vpop.f32.mrf.mxu1  ;;  %3229 = vmatpush3.bf16.msra.mxu1 %v3530_v2  ;;  %3251 = vmatpush3.bf16.msra.mxu0 %v3531_v9 }
 0x220   : > { %3230 = vmatprep.subr.bf16.mxu1 %v3820_v0  ;;  %3252 = vmatprep.subr.bf16.mxu0 %v3820_v0 }
 0x221   : > { %v3178_v17 = vpop.f32.mrf.mxu1  ;;  %3232 = vmatprep.mubr.msk.bf16.mxu1 %vm3821_vm0, %v3820_v0  ;;  %3254 = vmatprep.mubr.msk.bf16.mxu0 %vm3821_vm0, %v3820_v0 }
 0x223   : > { %v878_v19 = vpop.f32.mrf.mxu1  ;;  %3231 = vmatpush3.bf16.msra.mxu1 %v3532_v14  ;;  %3253 = vmatpush3.bf16.msra.mxu0 %v3533_v15 }
 0x224   : > { %3242 = vmatprep.subr.bf16.mxu1 %v3820_v0  ;;  %3264 = vmatprep.subr.bf16.mxu0 %v3820_v0  ;;  %v4211_v33 = vpack.c.bf16 %v878_v19, %v875_v13 }
 0x225   : > { %v3179_v23 = vpop.f32.mrf.mxu1 }
 0x226   : > { %3233 = vmatmul.mubr.msk.bf16.vlgmr.msra.gmra.mxu1 %vm900_vm2, %v4124_v31  ;;  %3255 = vmatmul.mubr.msk.bf16.vlgmr.msra.gmra.mxu0 %vm900_vm2, %v4067_v8 }
 0x227   : > { %v987_v24 = vpop.f32.mrf.mxu1  ;;  %3243 = vmatpush3.bf16.msra.mxu1 %v3534_v20  ;;  %3265 = vmatpush3.bf16.msra.mxu0 %v1576_v22 }
 0x228   : > { %v988_v27 = vadd.f32 %v987_v24, %v4132_v35  ;;  %3244 = vmatprep.subr.bf16.mxu1 %v3820_v0  ;;  %3246 = vmatprep.mubr.msk.bf16.mxu1 %vm3821_vm0, %v3820_v0  ;;  %v1530_v35 = vsel %vm949_vm3, %v1471_v29, 0 }
 0x229   : > { %v3192_v28 = vpop.f32.mrf.mxu1  ;;  %3266 = vmatprep.mubr.msk.bf16.mxu0 %vm3821_vm0, %v3820_v0  ;;  %3278 = vmatprep.subr.bf16.mxu0 %v3820_v0 }
 0x22a   : > { %v1043_v8 = vadd.f32 %v4158_v45, %v988_v27 }
 0x22b   : > { %v990_v32 = vpop.f32.mrf.mxu1  ;;  %3245 = vmatpush3.bf16.msra.mxu1 %v3535_v25 }
 0x22c   : > { %v991_v34 = vadd.f32 %v990_v32, %v4139_v37  ;;  %3258 = vmatprep.subr.bf16.mxu1 %v3820_v0 }
 0x22d   : > { %v3193_v38 = vpop.f32.mrf.mxu1 }
 0x22e   : > { %3247 = vmatmul.mubr.msk.bf16.vlgmr.msra.gmra.mxu1 %vm900_vm2, %v4211_v33  ;;  %3267 = vmatmul.mubr.msk.bf16.vlgmr.msra.gmra.mxu0 %vm945_vm4, %v4096_v16  ;;  %v1044_v39 = vadd.f32 %v4160_v48, %v991_v34  ;;  %v3537_v48 = vld [vmem:[#allocation10 + $0x10] sm:$0xff]  }
 0x22f   : > { %v1099_v40 = vpop.f32.mrf.mxu1  ;;  %3259 = vmatpush3.bf16.msra.mxu1 %v1530_v35  ;;  %3279 = vmatpush3.bf16.msra.mxu0 %v1684_v36  ;;  %v2970_v38 = vld [vmem:[#allocation7] ss:$0 sm:$0xff] }
 0x230   : > { %v4222_v41 = vadd.f32 %v1099_v40, %v1043_v8  ;;  %3260 = vmatprep.mubr.msk.bf16.mxu1 %vm3821_vm0, %v3820_v0  ;;  %3280 = vmatprep.mubr.msk.bf16.mxu0 %vm3821_vm0, %v3820_v0 }
 0x231   : > { %v3206_v37 = vpop.f32.mrf.mxu1  ;;  %3270 = vmatprep.subr.bf16.mxu1 %v3820_v0  ;;  %3292 = vmatprep.subr.bf16.mxu0 %v3820_v0 }
 0x233   : > { %v1102_v43 = vpop.f32.mrf.mxu1 }
 0x234   : > { %v4230_v45 = vadd.f32 %v1102_v43, %v1044_v39 }
 0x235   : > { %v3207_v47 = vpop.f32.mrf.mxu1 }
 0x236   : > { %3261 = vmatmul.mubr.msk.bf16.vlgmr.msra.gmra.mxu1 %vm945_vm4, %v4040_v3  ;;  %3281 = vmatmul.mubr.msk.bf16.vlgmr.msra.gmra.mxu0 %vm945_vm4, %v4165_v53 }
 0x237   : > { %3271 = vmatpush3.bf16.msra.mxu1 %v3536_v44  ;;  %3293 = vmatpush3.bf16.msra.mxu0 %v1792_v46 }
 0x238   : > { %3272 = vmatprep.subr.bf16.mxu1 %v3820_v0  ;;  %3274 = vmatprep.mubr.msk.bf16.mxu1 %vm3821_vm0, %v3820_v0 }
 0x239   : > { %3294 = vmatprep.mubr.msk.bf16.mxu0 %vm3821_vm0, %v3820_v0  ;;  %3306 = vmatprep.subr.bf16.mxu0 %v3820_v0 }
 0x23b   : > { %3273 = vmatpush3.bf16.msra.mxu1 %v3537_v48 }
 0x23c   : > { %3284 = vmatprep.subr.bf16.mxu1 %v3820_v0 }
 0x23e   : > { %3275 = vmatmul.mubr.msk.bf16.vlgmr.msra.gmra.mxu1 %vm900_vm2, %v4116_v26  ;;  %3295 = vmatmul.mubr.msk.bf16.vlgmr.msra.gmra.mxu0 %vm945_vm4, %v4108_v21  ;;  %v3541_v26 = vld [vmem:[#allocation10 + $0x30] sm:$0xff]  }
 0x23f   : > { %3285 = vmatpush3.bf16.msra.mxu1 %v3538_v50  ;;  %3307 = vmatpush3.bf16.msra.mxu0 %v1900_v51 }
 0x240   : > { %3286 = vmatprep.subr.bf16.mxu1 %v3820_v0  ;;  %3288 = vmatprep.mubr.msk.bf16.mxu1 %vm3821_vm0, %v3820_v0 }
 0x241   : > { %3308 = vmatprep.mubr.msk.bf16.mxu0 %vm3821_vm0, %v3820_v0  ;;  %3320 = vmatprep.subr.bf16.mxu0 %v3820_v0 }
 0x243   : > { %3287 = vmatpush3.bf16.msra.mxu1 %v3539_v52 }
 0x244   : > { %3298 = vmatprep.subr.bf16.mxu1 %v3820_v0 }
 0x246   : > { %3289 = vmatmul.mubr.msk.bf16.vlgmr.msra.gmra.mxu1 %vm900_vm2, %v4184_v11  ;;  %3309 = vmatmul.mubr.msk.bf16.vlgmr.msra.gmra.mxu0 %vm945_vm4, %v4182_v10 }
 0x247   : > { %3299 = vmatpush3.bf16.msra.mxu1 %v3540_v54  ;;  %3302 = vmatprep.mubr.msk.bf16.mxu1 %vm3821_vm0, %v3820_v0 }
 0x248   : > { %3300 = vmatprep.subr.bf16.mxu1 %v3820_v0  ;;  %3322 = vmatprep.mubr.msk.bf16.mxu0 %vm3821_vm0, %v3820_v0 }
 0x24b   : > { %3301 = vmatpush3.bf16.msra.mxu1 %v3541_v26 }
 0x24c   : > { %3312 = vmatprep.subr.bf16.mxu1 %v3820_v0 }
 0x24e   : > { %3303 = vmatmul.mubr.msk.bf16.vlgmr.msra.gmra.mxu1 %vm900_vm2, %v4124_v31 }
 0x24f   : > { %3313 = vmatpush3.bf16.msra.mxu1 %v3542_v55  ;;  %3316 = vmatprep.mubr.msk.bf16.mxu1 %vm3821_vm0, %v3820_v0 }
 0x250   : > { %3314 = vmatprep.subr.bf16.mxu1 %v3820_v0 }
 0x253   : > { %3315 = vmatpush3.bf16.msra.mxu1 %v3543_v56 }
 0x254   : > { %3326 = vmatprep.subr.bf16.mxu1 %v3820_v0 }
 0x256   : > { %3317 = vmatmul.mubr.msk.bf16.vlgmr.msra.gmra.mxu1 %vm900_vm2, %v4211_v33 }
 0x257   : > { %3328 = vmatprep.mubr.msk.bf16.mxu1 %vm3821_vm0, %v3820_v0 }
 0x2ce   : > { %v1150_v57 = vpop.f32.mrf.mxu0 }
 0x2cf   : > { %v1157_v12 = vadd.f32 %v1150_v57, %v4222_v41 }
 0x2d0   : > { %v3212_v58 = vpop.f32.mrf.mxu0 }
 0x2d2   : > { %v1153_v59 = vpop.f32.mrf.mxu0 }
 0x2d3   : > { %v1158_v19 = vadd.f32 %v1153_v59, %v4230_v45 }
 0x2d4   : > { %v3213_v31 = vpop.f32.mrf.mxu0 }
 0x2d6   : > { %v1264_v60 = vpop.f32.mrf.mxu0 }
 0x2d8   : > { %v3226_v61 = vpop.f32.mrf.mxu0 }
 0x2da   : > { %v1267_v62 = vpop.f32.mrf.mxu0 }
 0x2dc   : > { %v3227_v63 = vpop.f32.mrf.mxu0 }
 0x2de   : > { %v1213_v1 = vpop.f32.mrf.mxu1  ;;  %v1378_v2 = vpop.f32.mrf.mxu0 }
 0x2df   : > { %v1220_v15 = vadd.f32 %v1213_v1, %v1157_v12 }
 0x2e0   : > { %v3220_v9 = vpop.f32.mrf.mxu1  ;;  %v3240_v11 = vpop.f32.mrf.mxu0 }
 0x2e1   : > { %v1271_v24 = vadd.f32 %v1264_v60, %v1220_v15 }
 0x2e2   : > { %v1216_v13 = vpop.f32.mrf.mxu1  ;;  %v1381_v14 = vpop.f32.mrf.mxu0 }
 0x2e3   : > { %v1221_v23 = vadd.f32 %v1216_v13, %v1158_v19 }
 0x2e4   : > { %v3221_v17 = vpop.f32.mrf.mxu1  ;;  %v3241_v18 = vpop.f32.mrf.mxu0 }
 0x2e5   : > { %v1272_v8 = vadd.f32 %v1267_v62, %v1221_v23 }
 0x2e6   : > { %v1327_v20 = vpop.f32.mrf.mxu1  ;;  %v1522_v22 = vpop.f32.mrf.mxu0 }
 0x2e7   : > { %v1334_v28 = vadd.f32 %v1327_v20, %v1271_v24 }
 0x2e8   : > { %v3234_v25 = vpop.f32.mrf.mxu1  ;;  %v3256_v27 = vpop.f32.mrf.mxu0 }
 0x2e9   : > { %v1385_v35 = vadd.f32 %v1378_v2, %v1334_v28 }
 0x2ea   : > { %v1330_v29 = vpop.f32.mrf.mxu1  ;;  %v1525_v30 = vpop.f32.mrf.mxu0 }
 0x2eb   : > { %v1335_v34 = vadd.f32 %v1330_v29, %v1272_v8 }
 0x2ec   : > { %v3235_v32 = vpop.f32.mrf.mxu1  ;;  %v3257_v33 = vpop.f32.mrf.mxu0 }
 0x2ed   : > { %v1386_v43 = vadd.f32 %v1381_v14, %v1335_v34 }
 0x2ee   : > { %v1441_v36 = vpop.f32.mrf.mxu1  ;;  %v1612_v39 = vpop.f32.mrf.mxu0 }
 0x2ef   : > { %v1448_v40 = vadd.f32 %v1441_v36, %v1385_v35 }
 0x2f0   : > { %v3248_v41 = vpop.f32.mrf.mxu1  ;;  %v3268_v37 = vpop.f32.mrf.mxu0 }
 0x2f1   : > { %v1457_v42 = vadd.f32 %v2970_v38, %v1448_v40 }
 0x2f2   : > { %v1444_v44 = vpop.f32.mrf.mxu1  ;;  %v1615_v45 = vpop.f32.mrf.mxu0 }
 0x2f3   : > { %v2971_v46 = vmul.f32 -1.442695, %v1457_v42  ;;  %v1449_v47 = vadd.f32 %v1444_v44, %v1386_v43 }
 0x2f4   : > { %v3249_v48 = vpop.f32.mrf.mxu1  ;;  %v3269_v49 = vpop.f32.mrf.mxu0 }
 0x2f5   : > { %3554 = vpow2.f32 %v2971_v46  ;;  %v1458_v50 = vadd.f32 %v2970_v38, %v1449_v47 }
 0x2f6   : > { %v1566_v51 = vpop.f32.mrf.mxu1  ;;  %v1720_v52 = vpop.f32.mrf.mxu0 }
 0x2f7   : > { %v2972_v54 = vmul.f32 -1.442695, %v1458_v50  ;;  %v1567_v26 = vadd.f32 %v1566_v51, %v1522_v22 }
 0x2f8   : > { %v3262_v55 = vpop.f32.mrf.mxu1  ;;  %v3282_v56 = vpop.f32.mrf.mxu0 }
 0x2f9   : > { %3556 = vpow2.f32 %v2972_v54  ;;  %v1619_v57 = vadd.f32 %v1612_v39, %v1567_v26 }
 0x2fa   : > { %v1569_v58 = vpop.f32.mrf.mxu1  ;;  %v1723_v59 = vpop.f32.mrf.mxu0 }
 0x2fb   : > { %v1570_v31 = vadd.f32 %v1569_v58, %v1525_v30 }
 0x2fc   : > { %v3263_v60 = vpop.f32.mrf.mxu1  ;;  %v3283_v61 = vpop.f32.mrf.mxu0 }
 0x2fd   : > { %v1620_v62 = vadd.f32 %v1615_v45, %v1570_v31  ;;  %v3014_v60 = vld [vmem:[%s4469_s9 + $0x6] sm:$0x3] }
 0x2fe   : > { %v1672_v63 = vpop.f32.mrf.mxu1  ;;  %v1828_v1 = vpop.f32.mrf.mxu0  ;;  %v2527_v61 = vsel %vm949_vm3, %v3014_v60, 0 }
 0x2ff   : > { %v1679_v2 = vadd.f32 %v1672_v63, %v1619_v57  ;;  %v3004_v57 = vld [vmem:[%s4469_s9 + $0x2] sm:$0x3] }
 0x300   : > { %v3276_v9 = vpop.f32.mrf.mxu1  ;;  %v3296_v11 = vpop.f32.mrf.mxu0  ;;  %v2305_v58 = vsel %vm949_vm3, %v3004_v57, 0 }
 0x301   : > { %v1727_v12 = vadd.f32 %v1720_v52, %v1679_v2 }
 0x302   : > { %v3555_v13 = vpop.eup %3554  ;;  %v1675_v14 = vpop.f32.mrf.mxu1 }
 0x303   : > { %v1831_v15 = vpop.f32.mrf.mxu0  ;;  %v1465_v17 = vadd.f32 1.0, %v3555_v13  ;;  %v1680_v18 = vadd.f32 %v1675_v14, %v1620_v62 }
 0x304   : > { %v3277_v19 = vpop.f32.mrf.mxu1 }
 0x305   : > { %v3297_v20 = vpop.f32.mrf.mxu0  ;;  %v1728_v22 = vadd.f32 %v1723_v59, %v1680_v18  ;;  %3558 = vrcp.f32 %v1465_v17  ;;  %v3009_v59 = vld [vmem:[%s4469_s9 + $0x4] sm:$0x3] }
 0x306   : > { %v3557_v23 = vpop.eup %3556  ;;  %v1780_v24 = vpop.f32.mrf.mxu1  ;;  %v2416_v31 = vsel %vm949_vm3, %v3009_v59, 0  ;;  %v3546_v20 = vld [vmem:[#allocation11 + $0x18] sm:$0xff]  }
 0x307   : > { %v1936_v25 = vpop.f32.mrf.mxu0  ;;  %v1466_v27 = vadd.f32 1.0, %v3557_v23  ;;  %v1787_v28 = vadd.f32 %v1780_v24, %v1727_v12  ;;  %v3547_v24 = vld [vmem:[#allocation11 + $0x10] sm:$0xff]  }
 0x308   : > { %v3290_v29 = vpop.f32.mrf.mxu1 }
 0x309   : > { %v3310_v30 = vpop.f32.mrf.mxu0  ;;  %3560 = vrcp.f32 %v1466_v27  ;;  %v1835_v8 = vadd.f32 %v1828_v1, %v1787_v28 }
 0x30a   : > { %v1783_v32 = vpop.f32.mrf.mxu1 }
 0x30b   : > { %v1939_v33 = vpop.f32.mrf.mxu0  ;;  %v1788_v34 = vadd.f32 %v1783_v32, %v1728_v22 }
 0x30c   : > { %v3291_v35 = vpop.f32.mrf.mxu1 }
 0x30d   : > { %v3311_v36 = vpop.f32.mrf.mxu0  ;;  %v1836_v38 = vadd.f32 %v1831_v15, %v1788_v34 }
 0x30e   : > { %v1888_v39 = vpop.f32.mrf.mxu1 }
 0x30f   : > { %v1895_v40 = vadd.f32 %v1888_v39, %v1835_v8  ;;  %v3548_v39 = vld [vmem:[#allocation11 + $0x28] sm:$0xff]  }
 0x310   : > { %v3304_v41 = vpop.f32.mrf.mxu1 }
 0x311   : > { %v1943_v37 = vadd.f32 %v1936_v25, %v1895_v40  ;;  %v3549_v40 = vld [vmem:[#allocation11 + $0x20] sm:$0xff]  }
 0x312   : > { %v1891_v42 = vpop.f32.mrf.mxu1  ;;  %v3559_v44 = vpop.eup %3558 }
 0x313   : > { %v1896_v43 = vadd.f32 %v1891_v42, %v1836_v38  ;;  %v2026_v50 = vmul.f32 %v3559_v44, %v4054_v5  ;;  %v3544_v5 = vld [vmem:[#allocation11 + $0x8] sm:$0xff]  }
 0x314   : > { %v3305_v45 = vpop.f32.mrf.mxu1 }
 0x315   : > { %v1944_v46 = vadd.f32 %v1939_v33, %v1896_v43  ;;  %v3550_v43 = vld [vmem:[#allocation11 + $0x38] sm:$0xff]  }
 0x316   : > { %v3561_v47 = vpop.eup %3560  ;;  %v1996_v48 = vpop.f32.mrf.mxu1 }
 0x317   : > { %v4278_v49 = vadd.f32 %v1996_v48, %v1943_v37  ;;  %v2027_v51 = vmul.f32 %v3561_v47, %v4057_v6  ;;  %v3545_v6 = vld [vmem:[#allocation11] sm:$0xff]   ;;  %v3551_v47 = vld [vmem:[#allocation11 + $0x30] sm:$0xff]  }
 0x318   : > { %v3318_v52 = vpop.f32.mrf.mxu1 }
 0x319   : > { %v2028_v54 = vpack.c.bf16 %v2027_v51, %v2026_v50  ;;  %v3552_v51 = vld [vmem:[#allocation11 + $0x48] sm:$0xff]  }
 0x31a   : > { %v1999_v26 = vpop.f32.mrf.mxu1 }
 0x31b   : > { %v4282_v55 = vadd.f32 %v1999_v26, %v1944_v46  ;;  %3321 = vmatpush3.bf16.msra.mxu0 %v2028_v54  ;;  %v3553_v26 = vld [vmem:[#allocation11 + $0x40] sm:$0xff]  }
 0x31c   : > { %v3319_v56 = vpop.f32.mrf.mxu1  ;;  %3332 = vmatprep.subr.bf16.mxu0 %v3820_v0 }
 0x31e   : > { %3323 = vmatmul.mubr.msk.bf16.vlgmr.msra.gmra.mxu0 %vm531_vm1, %v4042_v4 }
 0x31f   : > { %3333 = vmatpush3.bf16.msra.mxu0 %v2028_v54  ;;  %3334 = vmatprep.mubr.msk.bf16.mxu0 %vm3821_vm0, %v3820_v0 }
 0x320   : > { %3344 = vmatprep.subr.bf16.mxu0 %v3820_v0 }
 0x326   : > { %3335 = vmatmul.mubr.msk.bf16.vlgmr.msra.gmra.mxu0 %vm531_vm1, %v4062_v7 }
 0x327   : > { %3345 = vmatpush3.bf16.msra.mxu0 %v3544_v5  ;;  %3348 = vmatprep.mubr.msk.bf16.mxu0 %vm3821_vm0, %v3820_v0 }
 0x328   : > { %3346 = vmatprep.subr.bf16.mxu0 %v3820_v0 }
 0x32b   : > { %3347 = vmatpush3.bf16.msra.mxu0 %v3545_v6 }
 0x32c   : > { %3358 = vmatprep.subr.bf16.mxu0 %v3820_v0 }
 0x32e   : > { %3349 = vmatmul.mubr.msk.bf16.vlgmr.msra.gmra.mxu0 %vm900_vm2, %v2028_v54 }
 0x32f   : > { %3359 = vmatpush3.bf16.msra.mxu0 %v2305_v58  ;;  %3360 = vmatprep.mubr.msk.bf16.mxu0 %vm3821_vm0, %v3820_v0 }
 0x330   : > { %3372 = vmatprep.subr.bf16.mxu0 %v3820_v0 }
 0x336   : > { %3361 = vmatmul.mubr.msk.bf16.vlgmr.msra.gmra.mxu0 %vm945_vm4, %v4096_v16  ;;  %v3019_v16 = vld [vmem:[%s4469_s9 + $0x8] sm:$0x3] }
 0x337   : > { %3373 = vmatpush3.bf16.msra.mxu0 %v2416_v31  ;;  %3374 = vmatprep.mubr.msk.bf16.mxu0 %vm3821_vm0, %v3820_v0  ;;  %v2638_v62 = vsel %vm949_vm3, %v3019_v16, 0 }
 0x338   : > { %3386 = vmatprep.subr.bf16.mxu0 %v3820_v0 }
 0x33e   : > { %3375 = vmatmul.mubr.msk.bf16.vlgmr.msra.gmra.mxu0 %vm945_vm4, %v4165_v53 }
 0x33f   : > { %3387 = vmatpush3.bf16.msra.mxu0 %v2527_v61  ;;  %3388 = vmatprep.mubr.msk.bf16.mxu0 %vm3821_vm0, %v3820_v0 }
 0x340   : > { %3400 = vmatprep.subr.bf16.mxu0 %v3820_v0 }
 0x346   : > { %3389 = vmatmul.mubr.msk.bf16.vlgmr.msra.gmra.mxu0 %vm945_vm4, %v4108_v21 }
 0x347   : > { %3401 = vmatpush3.bf16.msra.mxu0 %v2638_v62  ;;  %3402 = vmatprep.mubr.msk.bf16.mxu0 %vm3821_vm0, %v3820_v0 }
 0x34e   : > { %3403 = vmatmul.mubr.msk.bf16.vlgmr.msra.gmra.mxu0 %vm945_vm4, %v4182_v10  ;;  %v2197_v10 = vld [vmem:[%s4469_s9] sm:$0x3] }
 0x3de   : > { %v2063_v53 = vpop.f32.mrf.mxu0 }
 0x3e0   : > { %v3324_v63 = vpop.f32.mrf.mxu0 }
 0x3e2   : > { %v2066_v1 = vpop.f32.mrf.mxu0 }
 0x3e3   : > { %v2070_v2 = vpack.c.bf16 %v2066_v1, %v2063_v53  ;;  %v2993_v1 = vld [vmem:[%s4468_s8] ss:$0 sm:$0xff] }
 0x3e4   : > { %v3325_v9 = vpop.f32.mrf.mxu0 }
 0x3e5   : > { %3327 = vmatpush3.bf16.msra.mxu1 %v2070_v2  ;;  %v2013_v9 = vadd.f32 %v2993_v1, %v4282_v55 }
 0x3e6   : > { %v2147_v11 = vpop.f32.mrf.mxu0  ;;  %3338 = vmatprep.subr.bf16.mxu1 %v3820_v0 }
 0x3e8   : > { %3329 = vmatmul.mubr.msk.bf16.vlgmr.msra.gmra.mxu1 %vm531_vm1, %v4042_v4  ;;  %v3336_v21 = vpop.f32.mrf.mxu0  ;;  %v2259_v4 = vsel %vm949_vm3, %v2197_v10, 0 }
 0x3e9   : > { %3340 = vmatprep.mubr.msk.bf16.mxu1 %vm3821_vm0, %v3820_v0  ;;  %v2995_v21 = vmul.f32 -1.442695, %v2013_v9 }
 0x3ea   : > { %v2150_v12 = vpop.f32.mrf.mxu0 }
 0x3eb   : > { %v4337_v13 = vpack.c.bf16 %v2150_v12, %v2147_v11 }
 0x3ec   : > { %v3337_v14 = vpop.f32.mrf.mxu0 }
 0x3ed   : > { %3339 = vmatpush3.bf16.msra.mxu1 %v4337_v13 }
 0x3ee   : > { %v4343_v15 = vpop.f32.mrf.mxu0  ;;  %3352 = vmatprep.subr.bf16.mxu1 %v3820_v0 }
 0x3f0   : > { %3341 = vmatmul.mubr.msk.bf16.vlgmr.msra.gmra.mxu1 %vm531_vm1, %v4062_v7  ;;  %v3350_v17 = vpop.f32.mrf.mxu0 }
 0x3f1   : > { %3353 = vmatpush3.bf16.msra.mxu1 %v2259_v4  ;;  %3354 = vmatprep.mubr.msk.bf16.mxu1 %vm3821_vm0, %v3820_v0 }
 0x3f2   : > { %v4351_v18 = vpop.f32.mrf.mxu0  ;;  %3364 = vmatprep.subr.bf16.mxu1 %v3820_v0 }
 0x3f4   : > { %v3351_v19 = vpop.f32.mrf.mxu0 }
 0x3f6   : > { %v4354_v22 = vpop.f32.mrf.mxu0 }
 0x3f8   : > { %3355 = vmatmul.mubr.msk.bf16.vlgmr.msra.gmra.mxu1 %vm945_vm4, %v4040_v3  ;;  %v3362_v23 = vpop.f32.mrf.mxu0 }
 0x3f9   : > { %3365 = vmatpush3.bf16.msra.mxu1 %v3546_v20  ;;  %3368 = vmatprep.mubr.msk.bf16.mxu1 %vm3821_vm0, %v3820_v0 }
 0x3fa   : > { %v2344_v7 = vpop.f32.mrf.mxu0  ;;  %3366 = vmatprep.subr.bf16.mxu1 %v3820_v0 }
 0x3fc   : > { %v3363_v25 = vpop.f32.mrf.mxu0 }
 0x3fd   : > { %3367 = vmatpush3.bf16.msra.mxu1 %v3547_v24 }
 0x3fe   : > { %v4361_v27 = vpop.f32.mrf.mxu0  ;;  %3378 = vmatprep.subr.bf16.mxu1 %v3820_v0 }
 0x400   : > { %3369 = vmatmul.mubr.msk.bf16.vlgmr.msra.gmra.mxu1 %vm900_vm2, %v2070_v2  ;;  %v3376_v28 = vpop.f32.mrf.mxu0  ;;  %v2012_v2 = vadd.f32 %v2993_v1, %v4278_v49 }
 0x401   : > { %3382 = vmatprep.mubr.msk.bf16.mxu1 %vm3821_vm0, %v3820_v0  ;;  %3379 = vmatpush3.bf16.msra.mxu1 %v3548_v39 }
 0x402   : > { %v4367_v3 = vpop.f32.mrf.mxu0  ;;  %3380 = vmatprep.subr.bf16.mxu1 %v3820_v0  ;;  %v2994_v11 = vmul.f32 -1.442695, %v2012_v2 }
 0x404   : > { %v3377_v29 = vpop.f32.mrf.mxu0  ;;  %3562 = vpow2.f32 %v2994_v11 }
 0x405   : > { %3381 = vmatpush3.bf16.msra.mxu1 %v3549_v40  ;;  %3564 = vpow2.f32 %v2995_v21 }
 0x406   : > { %v4369_v30 = vpop.f32.mrf.mxu0  ;;  %3392 = vmatprep.subr.bf16.mxu1 %v3820_v0 }
 0x408   : > { %v3390_v8 = vpop.f32.mrf.mxu0 }
 0x40a   : > { %v4371_v32 = vpop.f32.mrf.mxu0 }
 0x40c   : > { %v3391_v33 = vpop.f32.mrf.mxu0 }
 0x40e   : > { %v4373_v34 = vpop.f32.mrf.mxu0 }
 0x410   : > { %v3404_v35 = vpop.f32.mrf.mxu0 }
 0x411   : > { %v3563_v49 = vpop.eup %3562 }
 0x412   : > { %v4375_v36 = vpop.f32.mrf.mxu0  ;;  %v3565_v24 = vpop.eup %3564 }
 0x413   : > { %v2021_v8 = vadd.f32 1.0, %v3565_v24 }
 0x414   : > { %v3405_v38 = vpop.f32.mrf.mxu0 }
 0x4a8   : > { %v2105_v41 = vpop.f32.mrf.mxu1 }
 0x4aa   : > { %v3330_v37 = vpop.f32.mrf.mxu1 }
 0x4ac   : > { %v2108_v42 = vpop.f32.mrf.mxu1 }
 0x4ad   : > { %v2112_v44 = vpack.c.bf16 %v2108_v42, %v2105_v41 }
 0x4ae   : > { %v3331_v45 = vpop.f32.mrf.mxu1 }
 0x4af   : > { %3383 = vmatmul.mubr.msk.bf16.vlgmr.msra.gmra.mxu1 %vm900_vm2, %v2112_v44  ;;  %v3574_v45 = vld [vmem:[%s4048_s17] sm:$0xff] }
 0x4b0   : > { %v2189_v46 = vpop.f32.mrf.mxu1  ;;  %3393 = vmatpush3.bf16.msra.mxu1 %v3550_v43  ;;  %3396 = vmatprep.mubr.msk.bf16.mxu1 %vm3821_vm0, %v3820_v0 }
 0x4b1   : > { %3394 = vmatprep.subr.bf16.mxu1 %v3820_v0 }
 0x4b2   : > { %v3342_v48 = vpop.f32.mrf.mxu1 }
 0x4b4   : > { %v2192_v50 = vpop.f32.mrf.mxu1  ;;  %3395 = vmatpush3.bf16.msra.mxu1 %v3551_v47 }
 0x4b5   : > { %3406 = vmatprep.subr.bf16.mxu1 %v3820_v0  ;;  %v2196_v57 = vpack.c.bf16 %v2192_v50, %v2189_v46 }
 0x4b6   : > { %v3343_v52 = vpop.f32.mrf.mxu1 }
 0x4b7   : > { %3397 = vmatmul.mubr.msk.bf16.vlgmr.msra.gmra.mxu1 %vm900_vm2, %v4337_v13 }
 0x4b8   : > { %v2295_v54 = vpop.f32.mrf.mxu1  ;;  %3407 = vmatpush3.bf16.msra.mxu1 %v3552_v51  ;;  %3410 = vmatprep.mubr.msk.bf16.mxu1 %vm3821_vm0, %v3820_v0  ;;  %v3575_v51 = vld [vmem:[%s4048_s17 + $0x8] sm:$0xff]  ;;  %s3732_s17 = scalar_lea.vmem %s4417_s27, 256 }
 0x4b9   : > { %3408 = vmatprep.subr.bf16.mxu1 %v3820_v0  ;;  %v2296_v5 = vadd.f32 %v2295_v54, %v4343_v15  ;;  %p3733_p2 = scmp.ne.s32.totalorder %s4417_s27, %s3732_s17  ;;  %p3740_p13 = scmp.lt.s32.totalorder %s3738_s16, %s3732_s17 }
 0x4ba   : > { %v3356_v56 = vpop.f32.mrf.mxu1 }
 0x4bb   : > { %v2348_v31 = vadd.f32 %v4354_v22, %v2296_v5  ;;  %p3734_p4 = pnand %p3733_p2, %p3928_p5  ;;  %p3741_p8 = por %p3740_p13, %p3739_p9 }
 0x4bc   : > { %v2298_v6 = vpop.f32.mrf.mxu1  ;;  %3409 = vmatpush3.bf16.msra.mxu1 %v3553_v26 }
 0x4bd   : > { %v2299_v59 = vadd.f32 %v2298_v6, %v4351_v18  ;;  %p3735_p7 = pneg %p3734_p4 }
 0x4be   : > { %v3357_v58 = vpop.f32.mrf.mxu1 }
 0x4bf   : > { %3411 = vmatmul.mubr.msk.bf16.vlgmr.msra.gmra.mxu1 %vm900_vm2, %v2196_v57  ;;  %v2349_v62 = vadd.f32 %v2344_v7, %v2299_v59  ;;  %v2020_v7 = vadd.f32 1.0, %v3563_v49  ;;  %p3742_p6 = pnand %p3741_p8, %p3735_p7 }
 0x4c0   : > { %v2404_v60 = vpop.f32.mrf.mxu1 }
 0x4c1   : > { %v2411_v61 = vadd.f32 %v2404_v60, %v2348_v31  ;;  %3566 = vrcp.f32 %v2020_v7 }
 0x4c2   : > { %v3370_v16 = vpop.f32.mrf.mxu1  ;;  %3568 = vrcp.f32 %v2021_v8 }
 0x4c3   : > { %v2459_v10 = vadd.f32 %v4361_v27, %v2411_v61 }
 0x4c4   : > { %v2407_v53 = vpop.f32.mrf.mxu1 }
 0x4c5   : > { %v2412_v63 = vadd.f32 %v2407_v53, %v2349_v62 }
 0x4c6   : > { %v3371_v0 = vpop.f32.mrf.mxu1 }
 0x4c7   : > { %v2460_v17 = vadd.f32 %v4367_v3, %v2412_v63  ;;  %v3024_v3 = vld [vmem:[%s4471_s11] ss:$0 sm:$0xff] }
 0x4ce   : > { %v3567_v37 = vpop.eup %3566 }
 0x4cf   : > { %v3569_v42 = vpop.eup %3568  ;;  %v2759_v43 = vsub.f32 1.0, %v3567_v37  ;;  %v2757_v46 = vmul.f32 %v3574_v45, %v3567_v37 }
 0x4d0   : > { %v2758_v52 = vmul.f32 %v3575_v51, %v3569_v42 }
 0x56f   : > { %v2515_v12 = vpop.f32.mrf.mxu1 }
 0x570   : > { %v2522_v15 = vadd.f32 %v2515_v12, %v2459_v10 }
 0x571   : > { %v3384_v13 = vpop.f32.mrf.mxu1 }
 0x572   : > { %v2570_v20 = vadd.f32 %v4369_v30, %v2522_v15 }
 0x573   : > { %v2518_v14 = vpop.f32.mrf.mxu1 }
 0x574   : > { %v2523_v19 = vadd.f32 %v2518_v14, %v2460_v17 }
 0x575   : > { %v3385_v4 = vpop.f32.mrf.mxu1 }
 0x576   : > { %v2571_v25 = vadd.f32 %v4371_v32, %v2523_v19 }
 0x577   : > { %v2626_v18 = vpop.f32.mrf.mxu1 }
 0x578   : > { %v2633_v55 = vadd.f32 %v2626_v18, %v2570_v20 }
 0x579   : > { %v3398_v22 = vpop.f32.mrf.mxu1 }
 0x57a   : > { %v2681_v27 = vadd.f32 %v4373_v34, %v2633_v55 }
 0x57b   : > { %v2629_v23 = vpop.f32.mrf.mxu1 }
 0x57c   : > { %v2634_v29 = vadd.f32 %v2629_v23, %v2571_v25 }
 0x57d   : > { %v3399_v28 = vpop.f32.mrf.mxu1 }
 0x57e   : > { %v2682_v39 = vadd.f32 %v4375_v36, %v2634_v29  ;;  %v2760_v36 = vsub.f32 1.0, %v3569_v42 }
 0x57f   : > { %v2737_v33 = vpop.f32.mrf.mxu1 }
 0x580   : > { %v2744_v30 = vadd.f32 %v2737_v33, %v2681_v27 }
 0x581   : > { %v3412_v35 = vpop.f32.mrf.mxu1 }
 0x582   : > { %v2753_v38 = vadd.f32 %v3024_v3, %v2744_v30 }
 0x583   : > { %v2740_v32 = vpop.f32.mrf.mxu1 }
 0x584   : > { %3570 = vtanh.f32 %v2753_v38  ;;  %v2745_v40 = vadd.f32 %v2740_v32, %v2682_v39 }
 0x585   : > { %v3413_v34 = vpop.f32.mrf.mxu1 }
 0x586   : > { %v2754_v41 = vadd.f32 %v3024_v3, %v2745_v40 }
 0x588   : > { %3572 = vtanh.f32 %v2754_v41 }
 0x591   : > { %v3571_v44 = vpop.eup %3570 }
 0x592   : > { %v2761_v47 = vmul.f32 %v3571_v44, %v2759_v43 }
 0x594   : > { %v2763_v48 = vadd.f32 %v2761_v47, %v2757_v46 }
 0x595   : > { %v3573_v50 = vpop.eup %3572 }
 0x596   : > { %v2762_v54 = vmul.f32 %v3573_v50, %v2760_v36  ;;  %2765 = vst.msk [vmem:[%s507_s19] sm:$0xff] %vm900_vm2, %v2763_v48 }
 0x598   : > { %v2764_v26 = vadd.f32 %v2762_v54, %v2758_v52 }
 0x59a   : > { %2766 = vst.msk [vmem:[%s507_s19 + $0x8] sm:$0xff] %vm900_vm2, %v2764_v26 }
 0x59b   : > { %3745 = shalt.err (!%p3742_p6)
}
 0x59c   : > { %s3746_s15 = scalar_lea.hbm %s4415_s20, 256  ;;  %s3750_s21 = scalar_lea.hbm %s4472_s12, 512 }
 0x59d   : > { %p3747_p11 = scmp.ne.s32.totalorder %s4415_s20, %s3746_s15  ;;  %p3751_p10 = scmp.lt.s32.totalorder %s4415_s20, %s4472_s12 }
 0x59e   : > { %p3752_p0 = scmp.lt.s32.totalorder %s3750_s21, %s3746_s15 }
 0x59f   : > { %p3748_p1 = pnand %p3747_p11, %p3928_p5 }
 0x5a0   : > { %p3753_p3 = por %p3752_p0, %p3751_p10 }
 0x5a1   : > { %p3749_p12 = pneg %p3748_p1 }
 0x5a3   : > { %p3754_p2 = pnand %p3753_p3, %p3749_p12 }
 0x5a5   : > { %3757 = shalt.err (!%p3754_p2)
}
 0x5a6   : > { %s3823_s19 = smov 128   ;;  %s3824_s14 = smov 8  }
 0x5a7   : > { %3438 = dma.vmem_to_hbm [thread:$0]  (%p3928_p5), %s4417_s27, 256, %s4415_s20, %s4420_s25, %s3823_s19, %s3823_s19, %s3824_s14  }
 0x5a8 PF: > { %s4505_s29 = sld [smem:[#allocation19_spill]]  ;;  %p3475_p4 = scmp.ge.s32.totalorder %s3808_s24, 2 }
 0x5a9   : > { %s4506_s17 = sld [smem:[#allocation23_spill]] }
 0x5ae   : > { %s2796_s28 = sand.u32 1, %s4505_s29  }
 0x5af   : > { %p4507_p7 = scmp.ne.s32.totalorder %s4506_s17, 0  ;;  %s2797_s2 = scalar_lea.sflag [#allocation4], %s2796_s28 }
 0x5b1   : > { %p3460_p9 = pnand %p3475_p4, %p4507_p7 }
 0x5b3   : > { %p3461_p13 = pneg %p3460_p9 }
 0x5b5   : > { %3791 = dma.done.wait (%p3461_p13), %s2797_s2, 256  }
 0x5b6   : > { %3793 = vsyncadd (%p3461_p13), %s2797_s2, 4294967040  ;;  %s4508_s24 = sld [smem:[#allocation21_spill]]  ;;  %s4511_s21 = smov %s3800_s22 }
 0x5b7   : > { %s4509_s16 = sld [smem:[#allocation20_spill]] }
 0x5b8   : > { %s4510_s23 = sld [smem:[#allocation22_spill]] }
 0x5bc   : > { %p26_p8 = scmp.ge.s32.totalorder %s4508_s24, 4  }
 0x5bd   : > { %s4512_s22 = smov %s4509_s16 }
 0x5be   :  { %28 = sbr.rel (!%p26_p8) target bundleno = 9 (0x9), region = 156 }
 0x5c3   :  { %2802 = vsyncpa [#allocation3], 1 }
 0x5c4   :  { %2804 = vsyncpa [#allocation3 + $0x1], 1 }
 0x5c5   :  { %2805 = vsyncpa [#allocation6], 1 }
 0x5c6   :  { %2806 = vsyncpa [#allocation9], 1 }
 0x5c7   :  { %2807 = vsyncpa [#allocation12], 1 }
 0x5c8   :  { %2808 = vsyncpa [#allocation4], 1 }
 0x5c9   :  { %2810 = vsyncpa [#allocation4 + $0x1], 1 }

</bundles_post_ra>
